<compile_context>
chip_gen: v7x
topology: tpu7x:2x2x1
jax: 0.10.0
libtpu: 0.0.40
codegen_flags: <defaults>
</compile_context>

<pallas_src>
import functools
import math

import jax
import jax.numpy as jnp
from jax.experimental import pallas as pl
from jax.experimental.pallas import tpu as pltpu


_VMEM_LIMIT = 48 * 1024 * 1024   # > v5e 16MiB scoped default, < v7x 64MiB phys


# ------------------------------- helpers ------------------------------------

def _round_up(x, m):
    return ((x + m - 1) // m) * m


def _pad_cast(x, shape, dtype):
    """Cast (if needed) and zero-pad (if needed) to `shape` — no-ops otherwise."""
    if x.dtype != dtype:
        x = x.astype(dtype)
    pads = tuple((0, t - s) for s, t in zip(x.shape, shape))
    if any(p[1] for p in pads):
        x = jnp.pad(x, pads)
    return x


def _pick_dim_tile(dim, cap=512):
    """Lane-dim (K/N) tile: full dim if it fits, else the largest 128-multiple
    tile whose padding waste stays small (prefers 512/256 — MXU-wide)."""
    if dim <= cap:
        return dim, dim                       # full-dim block, zero padding
    best = None
    for cand in (512, 256, 128):
        dp = _round_up(dim, cand)
        waste = dp - dim
        if waste * 16 <= dim:                 # < ~6% pad -> take largest tile
            return cand, dp
        if best is None or waste < best[2]:
            best = (cand, dp, waste)
    return best[0], best[1]


def _pick_m_tile(m, cap=256):
    """Row tile (16-aligned for bf16 sublane packing), minimizing pad rows."""
    mp = _round_up(m, 16)
    if mp <= cap:
        return mp, mp
    best_tm, best_mp = cap, _round_up(m, cap)
    for tm in range(cap, 127, -16):
        mpc = _round_up(m, tm)
        if mpc < best_mp:
            best_tm, best_mp = tm, mpc
    return best_tm, best_mp


# ----------------------------- Pallas kernels ------------------------------

def _linear_kernel(*refs, activation, has_residual):
    """Tiled matmul: bf16 operands, f32 accumulation, fused bias/act/residual."""
    if has_residual:
        x_ref, w_ref, b_ref, r_ref, o_ref, acc_ref = refs
    else:
        x_ref, w_ref, b_ref, o_ref, acc_ref = refs
        r_ref = None

    @pl.when(pl.program_id(2) == 0)
    def _():
        acc_ref[...] = jnp.zeros_like(acc_ref)

    acc_ref[...] += jnp.dot(x_ref[...], w_ref[...],
                            preferred_element_type=jnp.float32)

    @pl.when(pl.program_id(2) == pl.num_programs(2) - 1)
    def _():
        y = acc_ref[...] + b_ref[...]
        if activation == "gelu":
            # TODO(synk): torch.nn.GELU defaults to exact erf; tanh approx used
            # here (EUP-friendly, guaranteed to lower in Mosaic).
            y = jax.nn.gelu(y)
        elif activation == "relu":
            y = jnp.maximum(y, 0.0)
        if has_residual:
            y = y + r_ref[...].astype(jnp.float32)
        o_ref[...] = y.astype(o_ref.dtype)


def linear(x, w, b, activation=None, residual=None, out_dtype=jnp.bfloat16):
    """x: (M, K), w: (K, N) bf16, b: (N,) -> (M, N) out_dtype."""
    m, k = x.shape
    n = w.shape[1]
    tm, mp = _pick_m_tile(m)
    tk, kp = _pick_dim_tile(k)
    tn, np_ = _pick_dim_tile(n)

    xp = _pad_cast(x, (mp, kp), jnp.bfloat16)
    wp = _pad_cast(w, (kp, np_), jnp.bfloat16)
    bp = _pad_cast(b.reshape(1, -1), (1, np_), jnp.float32)

    inputs = [xp, wp, bp]
    in_specs = [
        pl.BlockSpec((tm, tk), lambda i, j, kk: (i, kk)),
        pl.BlockSpec((tk, tn), lambda i, j, kk: (kk, j)),
        pl.BlockSpec((1, tn), lambda i, j, kk: (0, j)),
    ]
    if residual is not None:
        rp = _pad_cast(residual, (mp, np_), jnp.bfloat16)
        inputs.append(rp)
        in_specs.append(pl.BlockSpec((tm, tn), lambda i, j, kk: (i, j)))

    out = pl.pallas_call(
        functools.partial(_linear_kernel, activation=activation,
                          has_residual=residual is not None),
        out_shape=jax.ShapeDtypeStruct((mp, np_), out_dtype),
        grid=(mp // tm, np_ // tn, kp // tk),
        in_specs=in_specs,
        out_specs=pl.BlockSpec((tm, tn), lambda i, j, kk: (i, j)),
        scratch_shapes=[pltpu.VMEM((tm, tn), jnp.float32)],
        compiler_params=pltpu.CompilerParams(
            dimension_semantics=("parallel", "parallel", "arbitrary"),
            vmem_limit_bytes=_VMEM_LIMIT),
        cost_estimate=pl.CostEstimate(
            flops=2 * mp * np_ * kp,
            transcendentals=0,
            bytes_accessed=2 * (mp * kp + kp * np_ + mp * np_)),
    )(*inputs)

    if (mp, np_) != (m, n):
        out = out[:m, :n]
    return out


def _mlp_kernel(*refs, activation, has_residual):
    """Fused FFN: act(x @ W1 + b1) @ W2 + b2 (+ residual).  The hidden-dim
    activation lives only in VMEM; grid axis 1 reduces over hidden tiles."""
    if has_residual:
        x_ref, w1_ref, b1_ref, w2_ref, b2_ref, r_ref, o_ref, acc_ref = refs
    else:
        x_ref, w1_ref, b1_ref, w2_ref, b2_ref, o_ref, acc_ref = refs
        r_ref = None

    @pl.when(pl.program_id(1) == 0)
    def _():
        acc_ref[...] = jnp.zeros_like(acc_ref)

    h = jnp.dot(x_ref[...], w1_ref[...],
                preferred_element_type=jnp.float32) + b1_ref[...]
    if activation == "gelu":
        h = jax.nn.gelu(h)
    else:
        h = jnp.maximum(h, 0.0)
    acc_ref[...] += jnp.dot(h.astype(jnp.bfloat16), w2_ref[...],
                            preferred_element_type=jnp.float32)

    @pl.when(pl.program_id(1) == pl.num_programs(1) - 1)
    def _():
        y = acc_ref[...] + b2_ref[...]
        if has_residual:
            y = y + r_ref[...].astype(jnp.float32)
        o_ref[...] = y.astype(o_ref.dtype)


def mlp(x, w1, b1, w2, b2, activation, residual=None, out_dtype=jnp.bfloat16):
    """x: (M, D) -> (M, D); fc1+act+fc2 (+residual) in a single pallas_call."""
    m, d = x.shape
    hid = w1.shape[1]
    tm, mp = _pick_m_tile(m)
    th, hp = _pick_dim_tile(hid)

    xp = _pad_cast(x, (mp, d), jnp.bfloat16)
    w1p = _pad_cast(w1, (d, hp), jnp.bfloat16)
    b1p = _pad_cast(b1.reshape(1, -1), (1, hp), jnp.float32)
    w2p = _pad_cast(w2, (hp, d), jnp.bfloat16)
    b2p = _pad_cast(b2.reshape(1, -1), (1, d), jnp.float32)

    inputs = [xp, w1p, b1p, w2p, b2p]
    in_specs = [
        pl.BlockSpec((tm, d), lambda i, j: (i, 0)),
        pl.BlockSpec((d, th), lambda i, j: (0, j)),
        pl.BlockSpec((1, th), lambda i, j: (0, j)),
        pl.BlockSpec((th, d), lambda i, j: (j, 0)),
        pl.BlockSpec((1, d), lambda i, j: (0, 0)),
    ]
    if residual is not None:
        rp = _pad_cast(residual, (mp, d), jnp.bfloat16)
        inputs.append(rp)
        in_specs.append(pl.BlockSpec((tm, d), lambda i, j: (i, 0)))

    out = pl.pallas_call(
        functools.partial(_mlp_kernel, activation=activation,
                          has_residual=residual is not None),
        out_shape=jax.ShapeDtypeStruct((mp, d), out_dtype),
        grid=(mp // tm, hp // th),
        in_specs=in_specs,
        out_specs=pl.BlockSpec((tm, d), lambda i, j: (i, 0)),
        scratch_shapes=[pltpu.VMEM((tm, d), jnp.float32)],
        compiler_params=pltpu.CompilerParams(
            dimension_semantics=("parallel", "arbitrary"),
            vmem_limit_bytes=_VMEM_LIMIT),
        cost_estimate=pl.CostEstimate(
            flops=4 * mp * hp * d,
            transcendentals=mp * hp,
            bytes_accessed=2 * (mp * d + d * hp + hp * d + mp * d)),
    )(*inputs)

    if mp != m:
        out = out[:m]
    return out


def _layernorm_kernel(*refs, eps, has_residual):
    if has_residual:
        x_ref, r_ref, g_ref, b_ref, o_ref = refs
        x = x_ref[...].astype(jnp.float32) + r_ref[...].astype(jnp.float32)
    else:
        x_ref, g_ref, b_ref, o_ref = refs
        x = x_ref[...].astype(jnp.float32)
    mean = jnp.mean(x, axis=-1, keepdims=True)
    var = jnp.mean(jnp.square(x - mean), axis=-1, keepdims=True)
    y = (x - mean) * jax.lax.rsqrt(var + eps) * g_ref[...] + b_ref[...]
    o_ref[...] = y.astype(o_ref.dtype)


def layer_norm(x, g, b, residual=None, eps=1e-5, out_dtype=jnp.bfloat16):
    """LayerNorm over last dim (f32 math inside), optional fused residual add.
    Accepts / emits bf16 — no wrapper-side f32 round trip."""
    shp = x.shape
    d = shp[-1]
    x2 = x.reshape(-1, d)
    m = x2.shape[0]
    tm, mp = _pick_m_tile(m)
    x2 = _pad_cast(x2, (mp, d), jnp.bfloat16)

    row_spec = pl.BlockSpec((tm, d), lambda i: (i, 0))
    vec_spec = pl.BlockSpec((1, d), lambda i: (0, 0))

    inputs = [x2]
    in_specs = [row_spec]
    if residual is not None:
        r2 = _pad_cast(residual.reshape(-1, d), (mp, d), jnp.bfloat16)
        inputs.append(r2)
        in_specs.append(row_spec)
    inputs += [g.reshape(1, d).astype(jnp.float32),
               b.reshape(1, d).astype(jnp.float32)]
    in_specs += [vec_spec, vec_spec]

    y = pl.pallas_call(
        functools.partial(_layernorm_kernel, eps=eps,
                          has_residual=residual is not None),
        out_shape=jax.ShapeDtypeStruct((mp, d), out_dtype),
        grid=(mp // tm,),
        in_specs=in_specs,
        out_specs=row_spec,
        compiler_params=pltpu.CompilerParams(
            dimension_semantics=("parallel",),
            vmem_limit_bytes=_VMEM_LIMIT),
    )(*inputs)
    return y[:m].reshape(shp)


def _attention_kernel(q_ref, k_ref, v_ref, o_ref, *, scale, causal):
    """One (batch, head) tile: QK^T -> softmax -> PV, f32 softmax, bf16 MXU."""
    q = q_ref[0, 0]                 # (Tq, hd) bf16
    k = k_ref[0, 0]                 # (Tk, hd) bf16
    v = v_ref[0, 0]                 # (Tk, hd) bf16
    # Contract last axes of q and k (no in-kernel transpose of K).
    s = jax.lax.dot_general(q, k, (((1,), (1,)), ((), ())),
                            preferred_element_type=jnp.float32) * scale
    if causal:
        tq, tk = s.shape
        row = jax.lax.broadcasted_iota(jnp.int32, (tq, tk), 0)
        col = jax.lax.broadcasted_iota(jnp.int32, (tq, tk), 1)
        s = jnp.where(row >= col, s, -1e30)
    s = s - jnp.max(s, axis=-1, keepdims=True)
    p = jnp.exp(s)
    p = p * pl.reciprocal(jnp.sum(p, axis=-1, keepdims=True), approx=True)
    o_ref[0, 0] = jnp.dot(p.astype(v.dtype), v,
                          preferred_element_type=jnp.float32).astype(o_ref.dtype)


def attention(q, k, v, *, n_head, scale, causal=False):
    """q: (B, Tq, D); k, v: (B, Tk, D) -> (B, Tq, D) bf16.
    Heads are grid-parallel: grid = (B, n_head), each step a dense hd-wide
    matmul (no per-head lane slices / relayouts inside the kernel)."""
    b, tq, d = q.shape
    tk = k.shape[1]
    hd = d // n_head

    def split_heads(x, t):
        return (x.astype(jnp.bfloat16)
                .reshape(b, t, n_head, hd).transpose(0, 2, 1, 3))

    qh, kh, vh = split_heads(q, tq), split_heads(k, tk), split_heads(v, tk)

    out = pl.pallas_call(
        functools.partial(_attention_kernel, scale=scale, causal=causal),
        out_shape=jax.ShapeDtypeStruct((b, n_head, tq, hd), jnp.bfloat16),
        grid=(b, n_head),
        in_specs=[
            pl.BlockSpec((1, 1, tq, hd), lambda i, h: (i, h, 0, 0)),
            pl.BlockSpec((1, 1, tk, hd), lambda i, h: (i, h, 0, 0)),
            pl.BlockSpec((1, 1, tk, hd), lambda i, h: (i, h, 0, 0)),
        ],
        out_specs=pl.BlockSpec((1, 1, tq, hd), lambda i, h: (i, h, 0, 0)),
        compiler_params=pltpu.CompilerParams(
            dimension_semantics=("parallel", "parallel"),
            vmem_limit_bytes=_VMEM_LIMIT),
        cost_estimate=pl.CostEstimate(
            flops=4 * b * n_head * tq * tk * hd,
            transcendentals=b * n_head * tq * tk,
            bytes_accessed=2 * b * n_head * (2 * tq * hd + 2 * tk * hd)),
    )(qh, kh, vh)
    # TODO(synk): if T grows large, add a Tk grid axis with online (flash)
    # softmax instead of whole-sequence K/V residency.
    return out.transpose(0, 2, 1, 3).reshape(b, tq, d)


# --------------------------- model building blocks --------------------------

def self_attention(x, p, n_head, causal=False, residual=None):
    """Fused QKV projection + multi-head attention + output projection.
    Optional residual is fused into the output-projection epilogue."""
    b, t, d = x.shape
    qkv = linear(x.reshape(b * t, d), p["wqkv"], p["bqkv"]).reshape(b, t, 3 * d)
    q, k, v = qkv[..., :d], qkv[..., d:2 * d], qkv[..., 2 * d:]
    o = attention(q, k, v, n_head=n_head,
                  scale=1.0 / math.sqrt(d // n_head), causal=causal)
    r2 = None if residual is None else residual.reshape(b * t, d)
    return linear(o.reshape(b * t, d), p["wo"], p["bo"],
                  residual=r2).reshape(b, t, d)


def cross_attention(x, memory, p, n_head):
    """Q from decoder state, fused KV projection from image memory."""
    b, tq, d = x.shape
    tk = memory.shape[1]
    q = linear(x.reshape(b * tq, d), p["wq"], p["bq"]).reshape(b, tq, d)
    kv = linear(memory.reshape(b * tk, d), p["wkv"], p["bkv"]).reshape(b, tk, 2 * d)
    k, v = kv[..., :d], kv[..., d:]
    o = attention(q, k, v, n_head=n_head, scale=1.0 / math.sqrt(d // n_head))
    return linear(o.reshape(b * tq, d), p["wo"], p["bo"]).reshape(b, tq, d)


def vision_encoder(image, params, n_head, patch):
    """image: (B, C, H, W) NCHW -> (B, 1 + num_patches, D) bf16."""
    b, c, h, w = image.shape
    gh, gw = h // patch, w // patch
    # conv(kernel=stride=patch) == unfold + matmul
    patches = image.reshape(b, c, gh, patch, gw, patch)
    patches = patches.transpose(0, 2, 4, 1, 3, 5).reshape(b * gh * gw,
                                                          c * patch * patch)
    d = params["patch_w"].shape[1]
    x = linear(patches, params["patch_w"], params["patch_b"]).reshape(b, gh * gw, d)
    cls = jnp.broadcast_to(params["cls"], (b, 1, d)).astype(x.dtype)
    x = jnp.concatenate([cls, x], axis=1)
    x = (x + params["pos"][None, : x.shape[1], :]).astype(jnp.bfloat16)
    # TODO(synk): dropout after pos-embed omitted (inference / eval mode).
    for lp in params["layers"]:
        # pre-LN: x = x + Attn(LN1(x)) ; x = x + MLP(LN2(x))
        h1 = layer_norm(x, lp["ln1_g"], lp["ln1_b"])
        x = self_attention(h1, lp["attn"], n_head, residual=x)
        h2 = layer_norm(x, lp["ln2_g"], lp["ln2_b"])
        x = mlp(h2.reshape(-1, d), lp["fc1_w"], lp["fc1_b"],
                lp["fc2_w"], lp["fc2_b"], activation="gelu",
                residual=x.reshape(-1, d)).reshape(x.shape)
    return layer_norm(x, params["ln_f_g"], params["ln_f_b"])


def text_decoder(memory, tokens, params, n_head):
    """memory: (B, S_img, D); tokens: (B, T) int32 -> (B, T, vocab) f32 logits."""
    b, t = tokens.shape
    d = memory.shape[-1]
    x = (params["tok_emb"][tokens] + params["pos_emb"][None, :t, :]
         ).astype(jnp.bfloat16)
    for lp in params["layers"]:
        # post-LN, matching torch.nn.TransformerDecoderLayer defaults:
        # residual adds fused into the LayerNorm kernels.
        sa = self_attention(x, lp["self_attn"], n_head, causal=True)
        x = layer_norm(x, lp["ln1_g"], lp["ln1_b"], residual=sa)
        ca = cross_attention(x, memory, lp["cross_attn"], n_head)
        x = layer_norm(x, lp["ln2_g"], lp["ln2_b"], residual=ca)
        f = mlp(x.reshape(-1, d), lp["fc1_w"], lp["fc1_b"],
                lp["fc2_w"], lp["fc2_b"], activation="relu").reshape(x.shape)
        x = layer_norm(x, lp["ln3_g"], lp["ln3_b"], residual=f)
    logits = linear(x.reshape(-1, d), params["out_w"], params["out_b"],
                    out_dtype=jnp.float32)
    return logits.reshape(b, t, -1)


def encoder_decoder(image, tokens, params, *, n_head, patch):
    image_embed = vision_encoder(image, params["encoder"], n_head, patch)
    return text_decoder(image_embed, tokens, params["decoder"], n_head)


# ------------------------------ param init ---------------------------------

def _dense(key, d_in, d_out):
    # Weights stored in bf16 so the kernels consume them directly (no per-call
    # cast/pad round trip); biases stay f32 (added to the f32 accumulator).
    w = (jax.random.normal(key, (d_in, d_out), jnp.float32) * 0.02
         ).astype(jnp.bfloat16)
    return w, jnp.zeros((d_out,), jnp.float32)


def _self_attn_params(key, d):
    ks = jax.random.split(key, 2)
    wqkv, bqkv = _dense(ks[0], d, 3 * d)
    wo, bo = _dense(ks[1], d, d)
    return dict(wqkv=wqkv, bqkv=bqkv, wo=wo, bo=bo)


def _cross_attn_params(key, d):
    ks = jax.random.split(key, 3)
    wq, bq = _dense(ks[0], d, d)
    wkv, bkv = _dense(ks[1], d, 2 * d)
    wo, bo = _dense(ks[2], d, d)
    return dict(wq=wq, bq=bq, wkv=wkv, bkv=bkv, wo=wo, bo=bo)


def init_params(key, *, c, patch, d, hidden, n_layers, vocab, max_pos, n_patches):
    ke, kd = jax.random.split(key)

    # --- encoder ---
    eks = jax.random.split(ke, 3 + n_layers)
    patch_w, patch_b = _dense(eks[0], c * patch * patch, d)
    cls = (jax.random.normal(eks[1], (1, d), jnp.float32) * 0.02).astype(jnp.bfloat16)
    pos = (jax.random.normal(eks[2], (1 + n_patches, d), jnp.float32) * 0.02
           ).astype(jnp.bfloat16)
    enc_layers = []
    for i in range(n_layers):
        lks = jax.random.split(eks[3 + i], 3)
        fc1_w, fc1_b = _dense(lks[0], d, hidden)
        fc2_w, fc2_b = _dense(lks[1], hidden, d)
        enc_layers.append(dict(
            attn=_self_attn_params(lks[2], d),
            ln1_g=jnp.ones((d,)), ln1_b=jnp.zeros((d,)),
            ln2_g=jnp.ones((d,)), ln2_b=jnp.zeros((d,)),
            fc1_w=fc1_w, fc1_b=fc1_b, fc2_w=fc2_w, fc2_b=fc2_b))
    encoder = dict(patch_w=patch_w, patch_b=patch_b, cls=cls, pos=pos,
                   layers=enc_layers,
                   ln_f_g=jnp.ones((d,)), ln_f_b=jnp.zeros((d,)))

    # --- decoder ---
    dks = jax.random.split(kd, 3 + n_layers)
    tok_emb = (jax.random.normal(dks[0], (vocab, d), jnp.float32) * 0.02
               ).astype(jnp.bfloat16)
    pos_emb = (jax.random.normal(dks[1], (max_pos, d), jnp.float32) * 0.02
               ).astype(jnp.bfloat16)
    out_w, out_b = _dense(dks[2], d, vocab)
    dec_layers = []
    for i in range(n_layers):
        lks = jax.random.split(dks[3 + i], 4)
        fc1_w, fc1_b = _dense(lks[0], d, hidden)
        fc2_w, fc2_b = _dense(lks[1], hidden, d)
        dec_layers.append(dict(
            self_attn=_self_attn_params(lks[2], d),
            cross_attn=_cross_attn_params(lks[3], d),
            ln1_g=jnp.ones((d,)), ln1_b=jnp.zeros((d,)),
            ln2_g=jnp.ones((d,)), ln2_b=jnp.zeros((d,)),
            ln3_g=jnp.ones((d,)), ln3_b=jnp.zeros((d,)),
            fc1_w=fc1_w, fc1_b=fc1_b, fc2_w=fc2_w, fc2_b=fc2_b))
    decoder = dict(tok_emb=tok_emb, pos_emb=pos_emb, layers=dec_layers,
                   out_w=out_w, out_b=out_b)

    return dict(encoder=encoder, decoder=decoder)


# --------------------------------- main -------------------------------------

if __name__ == "__main__":
    # Small shapes consistent with the module's forward:
    #   image (B, 3, H, W), tokens (B, T) -> logits (B, T, vocab)
    B, C, H, W = 2, 3, 32, 32
    PATCH = 16                      # -> 2x2 = 4 patches (+ cls token)
    D = 32                          # embedding_dim (scaled down from 768)
    HIDDEN = 64                     # FFN hidden_dim (scaled down from 2048)
    N_HEAD = 4
    N_LAYERS = 2
    VOCAB = 128
    MAX_POS = 64
    T = 8

    key = jax.random.PRNGKey(0)
    k_img, k_tok, k_par = jax.random.split(key, 3)
    image = jax.random.normal(k_img, (B, C, H, W), jnp.float32)
    tokens = jax.random.randint(k_tok, (B, T), 0, VOCAB, dtype=jnp.int32)

    params = init_params(k_par, c=C, patch=PATCH, d=D, hidden=HIDDEN,
                         n_layers=N_LAYERS, vocab=VOCAB, max_pos=MAX_POS,
                         n_patches=(H // PATCH) * (W // PATCH))

    fwd = jax.jit(functools.partial(encoder_decoder, n_head=N_HEAD, patch=PATCH))
    out = fwd(image, tokens, params)
    jax.block_until_ready(out)

    assert out.shape == (B, T, VOCAB), out.shape
    assert out.dtype == jnp.float32
    assert bool(jnp.all(jnp.isfinite(out)))
    print("KERNEL_OK")
</pallas_src>

<mosaic_0001>
module attributes {stable_mosaic.version = 11 : i64} {
  func.func @_linear_kernel(%arg0: i32, %arg1: i32, %arg2: i32, %arg3: memref<16x256xbf16, #tpu.memory_space<vmem>>, %arg4: memref<256x32xbf16, #tpu.memory_space<vmem>>, %arg5: memref<1x32xf32, #tpu.memory_space<vmem>>, %arg6: memref<16x32xbf16, #tpu.memory_space<vmem>>, %arg7: memref<16x32xf32, #tpu.memory_space<vmem>>) attributes {dimension_semantics = [#tpu.dimension_semantics<parallel>, #tpu.dimension_semantics<parallel>, #tpu.dimension_semantics<arbitrary>], iteration_bounds = array<i64: 1, 1, 3>, scalar_prefetch = 0 : i64, scratch_operands = 1 : i64, tpu.core_type = #tpu.core_type<tc>, window_params = [{transform_indices = @transform_0, window_bounds = array<i64: 16, 256>}, {transform_indices = @transform_1, window_bounds = array<i64: 256, 32>}, {transform_indices = @transform_2, window_bounds = array<i64: 1, 32>}, {transform_indices = @transform_3, window_bounds = array<i64: 16, 32>}]} {
    %c0_i32 = arith.constant 0 : i32
    %0 = arith.cmpi eq, %arg2, %c0_i32 : i32
    %1 = arith.extui %0 : i1 to i32
    %c0_i32_0 = arith.constant 0 : i32
    %2 = arith.cmpi ne, %1, %c0_i32_0 : i32
    scf.if %2 {
      %cst_9 = arith.constant 0.000000e+00 : f32
      %12 = vector.broadcast %cst_9 : f32 to vector<16x32xf32>
      %c0_10 = arith.constant 0 : index
      %c0_11 = arith.constant 0 : index
      %13 = vector.load %arg7[%c0_10, %c0_11] : memref<16x32xf32, #tpu.memory_space<vmem>>, vector<16x32xf32>
      tpu.vector_store %arg7[%c0_10, %c0_11], %12 {strides = array<i32>} : memref<16x32xf32, #tpu.memory_space<vmem>>, vector<16x32xf32>,
    } else {
    }
    %c0 = arith.constant 0 : index
    %c0_1 = arith.constant 0 : index
    %3 = vector.load %arg7[%c0, %c0_1] : memref<16x32xf32, #tpu.memory_space<vmem>>, vector<16x32xf32>
    %c0_2 = arith.constant 0 : index
    %c0_3 = arith.constant 0 : index
    %4 = vector.load %arg3[%c0_2, %c0_3] : memref<16x256xbf16, #tpu.memory_space<vmem>>, vector<16x256xbf16>
    %c0_4 = arith.constant 0 : index
    %c0_5 = arith.constant 0 : index
    %5 = vector.load %arg4[%c0_4, %c0_5] : memref<256x32xbf16, #tpu.memory_space<vmem>>, vector<256x32xbf16>
    %cst = arith.constant dense<0.000000e+00> : vector<16x32xf32>
    %6 = tpu.matmul %4, %5, %cst {dimension_numbers = #tpu.dot_dimension_numbers<[1], [0], [0], [1], [0, 0, 1, 1], [], []>} : vector<16x256xbf16>, vector<256x32xbf16>, vector<16x32xf32> -> vector<16x32xf32>
    %7 = arith.addf %3, %6 : vector<16x32xf32>
    %c0_6 = arith.constant 0 : index
    %c0_7 = arith.constant 0 : index
    %8 = vector.load %arg7[%c0_6, %c0_7] : memref<16x32xf32, #tpu.memory_space<vmem>>, vector<16x32xf32>
    tpu.vector_store %arg7[%c0_6, %c0_7], %7 {strides = array<i32>} : memref<16x32xf32, #tpu.memory_space<vmem>>, vector<16x32xf32>,
    %c2_i32 = arith.constant 2 : i32
    %9 = arith.cmpi eq, %arg2, %c2_i32 : i32
    %10 = arith.extui %9 : i1 to i32
    %c0_i32_8 = arith.constant 0 : i32
    %11 = arith.cmpi ne, %10, %c0_i32_8 : i32
    scf.if %11 {
      %c0_9 = arith.constant 0 : index
      %c0_10 = arith.constant 0 : index
      %12 = vector.load %arg7[%c0_9, %c0_10] : memref<16x32xf32, #tpu.memory_space<vmem>>, vector<16x32xf32>
      %c0_11 = arith.constant 0 : index
      %c0_12 = arith.constant 0 : index
      %13 = vector.load %arg5[%c0_11, %c0_12] : memref<1x32xf32, #tpu.memory_space<vmem>>, vector<1x32xf32>
      %14 = vector.broadcast %13 : vector<1x32xf32> to vector<16x32xf32>
      %15 = arith.addf %12, %14 : vector<16x32xf32>
      %16 = arith.truncf %15 : vector<16x32xf32> to vector<16x32xbf16>
      %c0_13 = arith.constant 0 : index
      %c0_14 = arith.constant 0 : index
      %17 = vector.load %arg6[%c0_13, %c0_14] : memref<16x32xbf16, #tpu.memory_space<vmem>>, vector<16x32xbf16>
      tpu.vector_store %arg6[%c0_13, %c0_14], %16 {strides = array<i32>} : memref<16x32xbf16, #tpu.memory_space<vmem>>, vector<16x32xbf16>,
    } else {
    }
    return
  }
  func.func @transform_0(%arg0: i32, %arg1: i32, %arg2: i32) -> (i32, i32) {
    %c0_i32 = arith.constant 0 : i32
    return %arg0, %arg2 : i32, i32
  }
  func.func @transform_1(%arg0: i32, %arg1: i32, %arg2: i32) -> (i32, i32) {
    %c0_i32 = arith.constant 0 : i32
    return %arg2, %arg1 : i32, i32
  }
  func.func @transform_2(%arg0: i32, %arg1: i32, %arg2: i32) -> (i32, i32) {
    %c0_i32 = arith.constant 0 : i32
    %c0_i32_0 = arith.constant 0 : i32
    return %c0_i32, %arg1 : i32, i32
  }
  func.func @transform_3(%arg0: i32, %arg1: i32, %arg2: i32) -> (i32, i32) {
    %c0_i32 = arith.constant 0 : i32
    return %arg0, %arg1 : i32, i32
  }
}

module attributes {stable_mosaic.version = 11 : i64} {
  func.func @_layernorm_kernel(%arg0: i32, %arg1: memref<16x32xbf16, #tpu.memory_space<vmem>>, %arg2: memref<1x32xf32, #tpu.memory_space<vmem>>, %arg3: memref<1x32xf32, #tpu.memory_space<vmem>>, %arg4: memref<16x32xbf16, #tpu.memory_space<vmem>>) attributes {dimension_semantics = [#tpu.dimension_semantics<parallel>], iteration_bounds = array<i64: 1>, scalar_prefetch = 0 : i64, scratch_operands = 0 : i64, tpu.core_type = #tpu.core_type<tc>, window_params = [{transform_indices = @transform_0, window_bounds = array<i64: 16, 32>}, {pipeline_mode = #tpu.pipeline_mode<synchronous>, transform_indices = @transform_1, window_bounds = array<i64: 1, 32>}, {pipeline_mode = #tpu.pipeline_mode<synchronous>, transform_indices = @transform_2, window_bounds = array<i64: 1, 32>}, {transform_indices = @transform_3, window_bounds = array<i64: 16, 32>}]} {
    %c0 = arith.constant 0 : index
    %c0_0 = arith.constant 0 : index
    %0 = vector.load %arg1[%c0, %c0_0] : memref<16x32xbf16, #tpu.memory_space<vmem>>, vector<16x32xbf16>
    %1 = arith.extf %0 : vector<16x32xbf16> to vector<16x32xf32>
    %cst = arith.constant dense<0.000000e+00> : vector<16xf32>
    %2 = vector.multi_reduction <add>, %1, %cst [1] : vector<16x32xf32> to vector<16xf32>
    %3 = vector.shape_cast %2 : vector<16xf32> to vector<16x1xf32>
    %cst_1 = arith.constant 3.200000e+01 : f32
    %4 = vector.broadcast %cst_1 : f32 to vector<16x1xf32>
    %5 = arith.divf %3, %4 : vector<16x1xf32>
    %6 = vector.broadcast %5 : vector<16x1xf32> to vector<16x32xf32>
    %7 = arith.subf %1, %6 : vector<16x32xf32>
    %8 = arith.mulf %7, %7 : vector<16x32xf32>
    %cst_2 = arith.constant dense<0.000000e+00> : vector<16xf32>
    %9 = vector.multi_reduction <add>, %8, %cst_2 [1] : vector<16x32xf32> to vector<16xf32>
    %10 = vector.shape_cast %9 : vector<16xf32> to vector<16x1xf32>
    %cst_3 = arith.constant 3.200000e+01 : f32
    %11 = vector.broadcast %cst_3 : f32 to vector<16x1xf32>
    %12 = arith.divf %10, %11 : vector<16x1xf32>
    %13 = vector.broadcast %5 : vector<16x1xf32> to vector<16x32xf32>
    %14 = arith.subf %1, %13 : vector<16x32xf32>
    %cst_4 = arith.constant 9.99999974E-6 : f32
    %15 = vector.broadcast %cst_4 : f32 to vector<16x1xf32>
    %16 = arith.addf %12, %15 : vector<16x1xf32>
    %17 = math.rsqrt %16 : vector<16x1xf32>
    %18 = vector.broadcast %17 : vector<16x1xf32> to vector<16x32xf32>
    %19 = arith.mulf %14, %18 : vector<16x32xf32>
    %c0_5 = arith.constant 0 : index
    %c0_6 = arith.constant 0 : index
    %20 = vector.load %arg2[%c0_5, %c0_6] : memref<1x32xf32, #tpu.memory_space<vmem>>, vector<1x32xf32>
    %21 = vector.broadcast %20 : vector<1x32xf32> to vector<16x32xf32>
    %22 = arith.mulf %19, %21 : vector<16x32xf32>
    %c0_7 = arith.constant 0 : index
    %c0_8 = arith.constant 0 : index
    %23 = vector.load %arg3[%c0_7, %c0_8] : memref<1x32xf32, #tpu.memory_space<vmem>>, vector<1x32xf32>
    %24 = vector.broadcast %23 : vector<1x32xf32> to vector<16x32xf32>
    %25 = arith.addf %22, %24 : vector<16x32xf32>
    %26 = arith.truncf %25 : vector<16x32xf32> to vector<16x32xbf16>
    %c0_9 = arith.constant 0 : index
    %c0_10 = arith.constant 0 : index
    %27 = vector.load %arg4[%c0_9, %c0_10] : memref<16x32xbf16, #tpu.memory_space<vmem>>, vector<16x32xbf16>
    tpu.vector_store %arg4[%c0_9, %c0_10], %26 {strides = array<i32>} : memref<16x32xbf16, #tpu.memory_space<vmem>>, vector<16x32xbf16>,
    return
  }
  func.func @transform_0(%arg0: i32) -> (i32, i32) {
    %c0_i32 = arith.constant 0 : i32
    %c0_i32_0 = arith.constant 0 : i32
    return %arg0, %c0_i32 : i32, i32
  }
  func.func @transform_1(%arg0: i32) -> (i32, i32) {
    %c0_i32 = arith.constant 0 : i32
    %c0_i32_0 = arith.constant 0 : i32
    %c0_i32_1 = arith.constant 0 : i32
    return %c0_i32, %c0_i32_0 : i32, i32
  }
  func.func @transform_2(%arg0: i32) -> (i32, i32) {
    %c0_i32 = arith.constant 0 : i32
    %c0_i32_0 = arith.constant 0 : i32
    %c0_i32_1 = arith.constant 0 : i32
    return %c0_i32, %c0_i32_0 : i32, i32
  }
  func.func @transform_3(%arg0: i32) -> (i32, i32) {
    %c0_i32 = arith.constant 0 : i32
    %c0_i32_0 = arith.constant 0 : i32
    return %arg0, %c0_i32 : i32, i32
  }
}

module attributes {stable_mosaic.version = 11 : i64} {
  func.func @_linear_kernel(%arg0: i32, %arg1: i32, %arg2: i32, %arg3: memref<16x32xbf16, #tpu.memory_space<vmem>>, %arg4: memref<32x96xbf16, #tpu.memory_space<vmem>>, %arg5: memref<1x96xf32, #tpu.memory_space<vmem>>, %arg6: memref<16x96xbf16, #tpu.memory_space<vmem>>, %arg7: memref<16x96xf32, #tpu.memory_space<vmem>>) attributes {dimension_semantics = [#tpu.dimension_semantics<parallel>, #tpu.dimension_semantics<parallel>, #tpu.dimension_semantics<arbitrary>], iteration_bounds = array<i64: 1, 1, 1>, scalar_prefetch = 0 : i64, scratch_operands = 1 : i64, tpu.core_type = #tpu.core_type<tc>, window_params = [{transform_indices = @transform_0, window_bounds = array<i64: 16, 32>}, {transform_indices = @transform_1, window_bounds = array<i64: 32, 96>}, {transform_indices = @transform_2, window_bounds = array<i64: 1, 96>}, {transform_indices = @transform_3, window_bounds = array<i64: 16, 96>}]} {
    %c0_i32 = arith.constant 0 : i32
    %0 = arith.cmpi eq, %arg2, %c0_i32 : i32
    %1 = arith.extui %0 : i1 to i32
    %c0_i32_0 = arith.constant 0 : i32
    %2 = arith.cmpi ne, %1, %c0_i32_0 : i32
    scf.if %2 {
      %cst_10 = arith.constant 0.000000e+00 : f32
      %12 = vector.broadcast %cst_10 : f32 to vector<16x96xf32>
      %c0_11 = arith.constant 0 : index
      %c0_12 = arith.constant 0 : index
      %13 = vector.load %arg7[%c0_11, %c0_12] : memref<16x96xf32, #tpu.memory_space<vmem>>, vector<16x96xf32>
      tpu.vector_store %arg7[%c0_11, %c0_12], %12 {strides = array<i32>} : memref<16x96xf32, #tpu.memory_space<vmem>>, vector<16x96xf32>,
    } else {
    }
    %c0 = arith.constant 0 : index
    %c0_1 = arith.constant 0 : index
    %3 = vector.load %arg7[%c0, %c0_1] : memref<16x96xf32, #tpu.memory_space<vmem>>, vector<16x96xf32>
    %c0_2 = arith.constant 0 : index
    %c0_3 = arith.constant 0 : index
    %4 = vector.load %arg3[%c0_2, %c0_3] : memref<16x32xbf16, #tpu.memory_space<vmem>>, vector<16x32xbf16>
    %c0_4 = arith.constant 0 : index
    %c0_5 = arith.constant 0 : index
    %5 = vector.load %arg4[%c0_4, %c0_5] : memref<32x96xbf16, #tpu.memory_space<vmem>>, vector<32x96xbf16>
    %cst = arith.constant dense<0.000000e+00> : vector<16x96xf32>
    %6 = tpu.matmul %4, %5, %cst {dimension_numbers = #tpu.dot_dimension_numbers<[1], [0], [0], [1], [0, 0, 1, 1], [], []>} : vector<16x32xbf16>, vector<32x96xbf16>, vector<16x96xf32> -> vector<16x96xf32>
    %7 = arith.addf %3, %6 : vector<16x96xf32>
    %c0_6 = arith.constant 0 : index
    %c0_7 = arith.constant 0 : index
    %8 = vector.load %arg7[%c0_6, %c0_7] : memref<16x96xf32, #tpu.memory_space<vmem>>, vector<16x96xf32>
    tpu.vector_store %arg7[%c0_6, %c0_7], %7 {strides = array<i32>} : memref<16x96xf32, #tpu.memory_space<vmem>>, vector<16x96xf32>,
    %c0_i32_8 = arith.constant 0 : i32
    %9 = arith.cmpi eq, %arg2, %c0_i32_8 : i32
    %10 = arith.extui %9 : i1 to i32
    %c0_i32_9 = arith.constant 0 : i32
    %11 = arith.cmpi ne, %10, %c0_i32_9 : i32
    scf.if %11 {
      %c0_10 = arith.constant 0 : index
      %c0_11 = arith.constant 0 : index
      %12 = vector.load %arg7[%c0_10, %c0_11] : memref<16x96xf32, #tpu.memory_space<vmem>>, vector<16x96xf32>
      %c0_12 = arith.constant 0 : index
      %c0_13 = arith.constant 0 : index
      %13 = vector.load %arg5[%c0_12, %c0_13] : memref<1x96xf32, #tpu.memory_space<vmem>>, vector<1x96xf32>
      %14 = vector.broadcast %13 : vector<1x96xf32> to vector<16x96xf32>
      %15 = arith.addf %12, %14 : vector<16x96xf32>
      %16 = arith.truncf %15 : vector<16x96xf32> to vector<16x96xbf16>
      %c0_14 = arith.constant 0 : index
      %c0_15 = arith.constant 0 : index
      %17 = vector.load %arg6[%c0_14, %c0_15] : memref<16x96xbf16, #tpu.memory_space<vmem>>, vector<16x96xbf16>
      tpu.vector_store %arg6[%c0_14, %c0_15], %16 {strides = array<i32>} : memref<16x96xbf16, #tpu.memory_space<vmem>>, vector<16x96xbf16>,
    } else {
    }
    return
  }
  func.func @transform_0(%arg0: i32, %arg1: i32, %arg2: i32) -> (i32, i32) {
    %c0_i32 = arith.constant 0 : i32
    return %arg0, %arg2 : i32, i32
  }
  func.func @transform_1(%arg0: i32, %arg1: i32, %arg2: i32) -> (i32, i32) {
    %c0_i32 = arith.constant 0 : i32
    return %arg2, %arg1 : i32, i32
  }
  func.func @transform_2(%arg0: i32, %arg1: i32, %arg2: i32) -> (i32, i32) {
    %c0_i32 = arith.constant 0 : i32
    %c0_i32_0 = arith.constant 0 : i32
    return %c0_i32, %arg1 : i32, i32
  }
  func.func @transform_3(%arg0: i32, %arg1: i32, %arg2: i32) -> (i32, i32) {
    %c0_i32 = arith.constant 0 : i32
    return %arg0, %arg1 : i32, i32
  }
}

module attributes {stable_mosaic.version = 11 : i64} {
  func.func @_attention_kernel(%arg0: i32, %arg1: i32, %arg2: memref<1x1x5x8xbf16, #tpu.memory_space<vmem>>, %arg3: memref<1x1x5x8xbf16, #tpu.memory_space<vmem>>, %arg4: memref<1x1x5x8xbf16, #tpu.memory_space<vmem>>, %arg5: memref<1x1x5x8xbf16, #tpu.memory_space<vmem>>) attributes {dimension_semantics = [#tpu.dimension_semantics<parallel>, #tpu.dimension_semantics<parallel>], iteration_bounds = array<i64: 2, 4>, scalar_prefetch = 0 : i64, scratch_operands = 0 : i64, tpu.core_type = #tpu.core_type<tc>, window_params = [{transform_indices = @transform_0, window_bounds = array<i64: 1, 1, 5, 8>}, {transform_indices = @transform_1, window_bounds = array<i64: 1, 1, 5, 8>}, {transform_indices = @transform_2, window_bounds = array<i64: 1, 1, 5, 8>}, {transform_indices = @transform_3, window_bounds = array<i64: 1, 1, 5, 8>}]} {
    %c0 = arith.constant 0 : index
    %c0_0 = arith.constant 0 : index
    %c0_1 = arith.constant 0 : index
    %c0_2 = arith.constant 0 : index
    %0 = vector.load %arg2[%c0, %c0_0, %c0_1, %c0_2] : memref<1x1x5x8xbf16, #tpu.memory_space<vmem>>, vector<1x1x5x8xbf16>
    %1 = vector.shape_cast %0 : vector<1x1x5x8xbf16> to vector<5x8xbf16>
    %c0_3 = arith.constant 0 : index
    %c0_4 = arith.constant 0 : index
    %c0_5 = arith.constant 0 : index
    %c0_6 = arith.constant 0 : index
    %2 = vector.load %arg3[%c0_3, %c0_4, %c0_5, %c0_6] : memref<1x1x5x8xbf16, #tpu.memory_space<vmem>>, vector<1x1x5x8xbf16>
    %3 = vector.shape_cast %2 : vector<1x1x5x8xbf16> to vector<5x8xbf16>
    %c0_7 = arith.constant 0 : index
    %c0_8 = arith.constant 0 : index
    %c0_9 = arith.constant 0 : index
    %c0_10 = arith.constant 0 : index
    %4 = vector.load %arg4[%c0_7, %c0_8, %c0_9, %c0_10] : memref<1x1x5x8xbf16, #tpu.memory_space<vmem>>, vector<1x1x5x8xbf16>
    %5 = vector.shape_cast %4 : vector<1x1x5x8xbf16> to vector<5x8xbf16>
    %cst = arith.constant dense<0.000000e+00> : vector<5x5xf32>
    %6 = tpu.matmul %1, %3, %cst {dimension_numbers = #tpu.dot_dimension_numbers<[1], [1], [0], [0], [0, 0, 1, 0], [], []>} : vector<5x8xbf16>, vector<5x8xbf16>, vector<5x5xf32> -> vector<5x5xf32>
    %cst_11 = arith.constant 0.353553385 : f32
    %7 = vector.broadcast %cst_11 : f32 to vector<5x5xf32>
    %8 = arith.mulf %6, %7 : vector<5x5xf32>
    %cst_12 = arith.constant dense<0xFF800000> : vector<5xf32>
    %9 = vector.multi_reduction <maximumf>, %8, %cst_12 [1] : vector<5x5xf32> to vector<5xf32>
    %10 = vector.shape_cast %9 : vector<5xf32> to vector<5x1xf32>
    %11 = vector.broadcast %10 : vector<5x1xf32> to vector<5x5xf32>
    %12 = arith.subf %8, %11 : vector<5x5xf32>
    %13 = math.exp %12 : vector<5x5xf32>
    %cst_13 = arith.constant dense<0.000000e+00> : vector<5xf32>
    %14 = vector.multi_reduction <add>, %13, %cst_13 [1] : vector<5x5xf32> to vector<5xf32>
    %15 = vector.shape_cast %14 : vector<5xf32> to vector<5x1xf32>
    %16 = tpu.reciprocal %15 {approx = true} : vector<5x1xf32> -> vector<5x1xf32>
    %17 = vector.broadcast %16 : vector<5x1xf32> to vector<5x5xf32>
    %18 = arith.mulf %13, %17 : vector<5x5xf32>
    %19 = arith.truncf %18 : vector<5x5xf32> to vector<5x5xbf16>
    %cst_14 = arith.constant dense<0.000000e+00> : vector<5x8xf32>
    %20 = tpu.matmul %19, %5, %cst_14 {dimension_numbers = #tpu.dot_dimension_numbers<[1], [0], [0], [1], [0, 0, 1, 1], [], []>} : vector<5x5xbf16>, vector<5x8xbf16>, vector<5x8xf32> -> vector<5x8xf32>
    %21 = arith.truncf %20 : vector<5x8xf32> to vector<5x8xbf16>
    %c0_15 = arith.constant 0 : index
    %c0_16 = arith.constant 0 : index
    %c0_17 = arith.constant 0 : index
    %c0_18 = arith.constant 0 : index
    %22 = vector.load %arg5[%c0_15, %c0_16, %c0_17, %c0_18] : memref<1x1x5x8xbf16, #tpu.memory_space<vmem>>, vector<1x1x5x8xbf16>
    %23 = vector.shape_cast %22 : vector<1x1x5x8xbf16> to vector<5x8xbf16>
    %24 = vector.shape_cast %21 : vector<5x8xbf16> to vector<1x1x5x8xbf16>
    tpu.vector_store %arg5[%c0_15, %c0_16, %c0_17, %c0_18], %24 {strides = array<i32>} : memref<1x1x5x8xbf16, #tpu.memory_space<vmem>>, vector<1x1x5x8xbf16>,
    return
  }
  func.func @transform_0(%arg0: i32, %arg1: i32) -> (i32, i32, i32, i32) {
    %c0_i32 = arith.constant 0 : i32
    %c0_i32_0 = arith.constant 0 : i32
    %c0_i32_1 = arith.constant 0 : i32
    return %arg0, %arg1, %c0_i32, %c0_i32_0 : i32, i32, i32, i32
  }
  func.func @transform_1(%arg0: i32, %arg1: i32) -> (i32, i32, i32, i32) {
    %c0_i32 = arith.constant 0 : i32
    %c0_i32_0 = arith.constant 0 : i32
    %c0_i32_1 = arith.constant 0 : i32
    return %arg0, %arg1, %c0_i32, %c0_i32_0 : i32, i32, i32, i32
  }
  func.func @transform_2(%arg0: i32, %arg1: i32) -> (i32, i32, i32, i32) {
    %c0_i32 = arith.constant 0 : i32
    %c0_i32_0 = arith.constant 0 : i32
    %c0_i32_1 = arith.constant 0 : i32
    return %arg0, %arg1, %c0_i32, %c0_i32_0 : i32, i32, i32, i32
  }
  func.func @transform_3(%arg0: i32, %arg1: i32) -> (i32, i32, i32, i32) {
    %c0_i32 = arith.constant 0 : i32
    %c0_i32_0 = arith.constant 0 : i32
    %c0_i32_1 = arith.constant 0 : i32
    return %arg0, %arg1, %c0_i32, %c0_i32_0 : i32, i32, i32, i32
  }
}

module attributes {stable_mosaic.version = 11 : i64} {
  func.func @_linear_kernel(%arg0: i32, %arg1: i32, %arg2: i32, %arg3: memref<16x32xbf16, #tpu.memory_space<vmem>>, %arg4: memref<32x32xbf16, #tpu.memory_space<vmem>>, %arg5: memref<1x32xf32, #tpu.memory_space<vmem>>, %arg6: memref<16x32xbf16, #tpu.memory_space<vmem>>, %arg7: memref<16x32xbf16, #tpu.memory_space<vmem>>, %arg8: memref<16x32xf32, #tpu.memory_space<vmem>>) attributes {dimension_semantics = [#tpu.dimension_semantics<parallel>, #tpu.dimension_semantics<parallel>, #tpu.dimension_semantics<arbitrary>], iteration_bounds = array<i64: 1, 1, 1>, scalar_prefetch = 0 : i64, scratch_operands = 1 : i64, tpu.core_type = #tpu.core_type<tc>, window_params = [{transform_indices = @transform_0, window_bounds = array<i64: 16, 32>}, {transform_indices = @transform_1, window_bounds = array<i64: 32, 32>}, {transform_indices = @transform_2, window_bounds = array<i64: 1, 32>}, {transform_indices = @transform_3, window_bounds = array<i64: 16, 32>}, {transform_indices = @transform_4, window_bounds = array<i64: 16, 32>}]} {
    %c0_i32 = arith.constant 0 : i32
    %0 = arith.cmpi eq, %arg2, %c0_i32 : i32
    %1 = arith.extui %0 : i1 to i32
    %c0_i32_0 = arith.constant 0 : i32
    %2 = arith.cmpi ne, %1, %c0_i32_0 : i32
    scf.if %2 {
      %cst_10 = arith.constant 0.000000e+00 : f32
      %12 = vector.broadcast %cst_10 : f32 to vector<16x32xf32>
      %c0_11 = arith.constant 0 : index
      %c0_12 = arith.constant 0 : index
      %13 = vector.load %arg8[%c0_11, %c0_12] : memref<16x32xf32, #tpu.memory_space<vmem>>, vector<16x32xf32>
      tpu.vector_store %arg8[%c0_11, %c0_12], %12 {strides = array<i32>} : memref<16x32xf32, #tpu.memory_space<vmem>>, vector<16x32xf32>,
    } else {
    }
    %c0 = arith.constant 0 : index
    %c0_1 = arith.constant 0 : index
    %3 = vector.load %arg8[%c0, %c0_1] : memref<16x32xf32, #tpu.memory_space<vmem>>, vector<16x32xf32>
    %c0_2 = arith.constant 0 : index
    %c0_3 = arith.constant 0 : index
    %4 = vector.load %arg3[%c0_2, %c0_3] : memref<16x32xbf16, #tpu.memory_space<vmem>>, vector<16x32xbf16>
    %c0_4 = arith.constant 0 : index
    %c0_5 = arith.constant 0 : index
    %5 = vector.load %arg4[%c0_4, %c0_5] : memref<32x32xbf16, #tpu.memory_space<vmem>>, vector<32x32xbf16>
    %cst = arith.constant dense<0.000000e+00> : vector<16x32xf32>
    %6 = tpu.matmul %4, %5, %cst {dimension_numbers = #tpu.dot_dimension_numbers<[1], [0], [0], [1], [0, 0, 1, 1], [], []>} : vector<16x32xbf16>, vector<32x32xbf16>, vector<16x32xf32> -> vector<16x32xf32>
    %7 = arith.addf %3, %6 : vector<16x32xf32>
    %c0_6 = arith.constant 0 : index
    %c0_7 = arith.constant 0 : index
    %8 = vector.load %arg8[%c0_6, %c0_7] : memref<16x32xf32, #tpu.memory_space<vmem>>, vector<16x32xf32>
    tpu.vector_store %arg8[%c0_6, %c0_7], %7 {strides = array<i32>} : memref<16x32xf32, #tpu.memory_space<vmem>>, vector<16x32xf32>,
    %c0_i32_8 = arith.constant 0 : i32
    %9 = arith.cmpi eq, %arg2, %c0_i32_8 : i32
    %10 = arith.extui %9 : i1 to i32
    %c0_i32_9 = arith.constant 0 : i32
    %11 = arith.cmpi ne, %10, %c0_i32_9 : i32
    scf.if %11 {
      %c0_10 = arith.constant 0 : index
      %c0_11 = arith.constant 0 : index
      %12 = vector.load %arg8[%c0_10, %c0_11] : memref<16x32xf32, #tpu.memory_space<vmem>>, vector<16x32xf32>
      %c0_12 = arith.constant 0 : index
      %c0_13 = arith.constant 0 : index
      %13 = vector.load %arg5[%c0_12, %c0_13] : memref<1x32xf32, #tpu.memory_space<vmem>>, vector<1x32xf32>
      %14 = vector.broadcast %13 : vector<1x32xf32> to vector<16x32xf32>
      %15 = arith.addf %12, %14 : vector<16x32xf32>
      %c0_14 = arith.constant 0 : index
      %c0_15 = arith.constant 0 : index
      %16 = vector.load %arg6[%c0_14, %c0_15] : memref<16x32xbf16, #tpu.memory_space<vmem>>, vector<16x32xbf16>
      %17 = arith.extf %16 : vector<16x32xbf16> to vector<16x32xf32>
      %18 = arith.addf %15, %17 : vector<16x32xf32>
      %19 = arith.truncf %18 : vector<16x32xf32> to vector<16x32xbf16>
      %c0_16 = arith.constant 0 : index
      %c0_17 = arith.constant 0 : index
      %20 = vector.load %arg7[%c0_16, %c0_17] : memref<16x32xbf16, #tpu.memory_space<vmem>>, vector<16x32xbf16>
      tpu.vector_store %arg7[%c0_16, %c0_17], %19 {strides = array<i32>} : memref<16x32xbf16, #tpu.memory_space<vmem>>, vector<16x32xbf16>,
    } else {
    }
    return
  }
  func.func @transform_0(%arg0: i32, %arg1: i32, %arg2: i32) -> (i32, i32) {
    %c0_i32 = arith.constant 0 : i32
    return %arg0, %arg2 : i32, i32
  }
  func.func @transform_1(%arg0: i32, %arg1: i32, %arg2: i32) -> (i32, i32) {
    %c0_i32 = arith.constant 0 : i32
    return %arg2, %arg1 : i32, i32
  }
  func.func @transform_2(%arg0: i32, %arg1: i32, %arg2: i32) -> (i32, i32) {
    %c0_i32 = arith.constant 0 : i32
    %c0_i32_0 = arith.constant 0 : i32
    return %c0_i32, %arg1 : i32, i32
  }
  func.func @transform_3(%arg0: i32, %arg1: i32, %arg2: i32) -> (i32, i32) {
    %c0_i32 = arith.constant 0 : i32
    return %arg0, %arg1 : i32, i32
  }
  func.func @transform_4(%arg0: i32, %arg1: i32, %arg2: i32) -> (i32, i32) {
    %c0_i32 = arith.constant 0 : i32
    return %arg0, %arg1 : i32, i32
  }
}

module attributes {stable_mosaic.version = 11 : i64} {
  func.func @_mlp_kernel(%arg0: i32, %arg1: i32, %arg2: memref<16x32xbf16, #tpu.memory_space<vmem>>, %arg3: memref<32x64xbf16, #tpu.memory_space<vmem>>, %arg4: memref<1x64xf32, #tpu.memory_space<vmem>>, %arg5: memref<64x32xbf16, #tpu.memory_space<vmem>>, %arg6: memref<1x32xf32, #tpu.memory_space<vmem>>, %arg7: memref<16x32xbf16, #tpu.memory_space<vmem>>, %arg8: memref<16x32xbf16, #tpu.memory_space<vmem>>, %arg9: memref<16x32xf32, #tpu.memory_space<vmem>>) attributes {dimension_semantics = [#tpu.dimension_semantics<parallel>, #tpu.dimension_semantics<arbitrary>], iteration_bounds = array<i64: 1, 1>, scalar_prefetch = 0 : i64, scratch_operands = 1 : i64, tpu.core_type = #tpu.core_type<tc>, window_params = [{transform_indices = @transform_0, window_bounds = array<i64: 16, 32>}, {transform_indices = @transform_1, window_bounds = array<i64: 32, 64>}, {transform_indices = @transform_2, window_bounds = array<i64: 1, 64>}, {transform_indices = @transform_3, window_bounds = array<i64: 64, 32>}, {pipeline_mode = #tpu.pipeline_mode<synchronous>, transform_indices = @transform_4, window_bounds = array<i64: 1, 32>}, {transform_indices = @transform_5, window_bounds = array<i64: 16, 32>}, {transform_indices = @transform_6, window_bounds = array<i64: 16, 32>}]} {
    %c0_i32 = arith.constant 0 : i32
    %0 = arith.cmpi eq, %arg1, %c0_i32 : i32
    %1 = arith.extui %0 : i1 to i32
    %c0_i32_0 = arith.constant 0 : i32
    %2 = arith.cmpi ne, %1, %c0_i32_0 : i32
    scf.if %2 {
      %cst_19 = arith.constant 0.000000e+00 : f32
      %31 = vector.broadcast %cst_19 : f32 to vector<16x32xf32>
      %c0_20 = arith.constant 0 : index
      %c0_21 = arith.constant 0 : index
      %32 = vector.load %arg9[%c0_20, %c0_21] : memref<16x32xf32, #tpu.memory_space<vmem>>, vector<16x32xf32>
      tpu.vector_store %arg9[%c0_20, %c0_21], %31 {strides = array<i32>} : memref<16x32xf32, #tpu.memory_space<vmem>>, vector<16x32xf32>,
    } else {
    }
    %c0 = arith.constant 0 : index
    %c0_1 = arith.constant 0 : index
    %3 = vector.load %arg2[%c0, %c0_1] : memref<16x32xbf16, #tpu.memory_space<vmem>>, vector<16x32xbf16>
    %c0_2 = arith.constant 0 : index
    %c0_3 = arith.constant 0 : index
    %4 = vector.load %arg3[%c0_2, %c0_3] : memref<32x64xbf16, #tpu.memory_space<vmem>>, vector<32x64xbf16>
    %cst = arith.constant dense<0.000000e+00> : vector<16x64xf32>
    %5 = tpu.matmul %3, %4, %cst {dimension_numbers = #tpu.dot_dimension_numbers<[1], [0], [0], [1], [0, 0, 1, 1], [], []>} : vector<16x32xbf16>, vector<32x64xbf16>, vector<16x64xf32> -> vector<16x64xf32>
    %c0_4 = arith.constant 0 : index
    %c0_5 = arith.constant 0 : index
    %6 = vector.load %arg4[%c0_4, %c0_5] : memref<1x64xf32, #tpu.memory_space<vmem>>, vector<1x64xf32>
    %7 = vector.broadcast %6 : vector<1x64xf32> to vector<16x64xf32>
    %8 = arith.addf %5, %7 : vector<16x64xf32>
    %9 = arith.mulf %8, %8 : vector<16x64xf32>
    %10 = arith.mulf %8, %9 : vector<16x64xf32>
    %cst_6 = arith.constant 4.471500e-02 : f32
    %11 = vector.broadcast %cst_6 : f32 to vector<16x64xf32>
    %12 = arith.mulf %11, %10 : vector<16x64xf32>
    %13 = arith.addf %8, %12 : vector<16x64xf32>
    %cst_7 = arith.constant 0.797884583 : f32
    %14 = vector.broadcast %cst_7 : f32 to vector<16x64xf32>
    %15 = arith.mulf %14, %13 : vector<16x64xf32>
    %16 = math.tanh %15 : vector<16x64xf32>
    %cst_8 = arith.constant 1.000000e+00 : f32
    %17 = vector.broadcast %cst_8 : f32 to vector<16x64xf32>
    %18 = arith.addf %17, %16 : vector<16x64xf32>
    %cst_9 = arith.constant 5.000000e-01 : f32
    %19 = vector.broadcast %cst_9 : f32 to vector<16x64xf32>
    %20 = arith.mulf %19, %18 : vector<16x64xf32>
    %21 = arith.mulf %8, %20 : vector<16x64xf32>
    %c0_10 = arith.constant 0 : index
    %c0_11 = arith.constant 0 : index
    %22 = vector.load %arg9[%c0_10, %c0_11] : memref<16x32xf32, #tpu.memory_space<vmem>>, vector<16x32xf32>
    %23 = arith.truncf %21 : vector<16x64xf32> to vector<16x64xbf16>
    %c0_12 = arith.constant 0 : index
    %c0_13 = arith.constant 0 : index
    %24 = vector.load %arg5[%c0_12, %c0_13] : memref<64x32xbf16, #tpu.memory_space<vmem>>, vector<64x32xbf16>
    %cst_14 = arith.constant dense<0.000000e+00> : vector<16x32xf32>
    %25 = tpu.matmul %23, %24, %cst_14 {dimension_numbers = #tpu.dot_dimension_numbers<[1], [0], [0], [1], [0, 0, 1, 1], [], []>} : vector<16x64xbf16>, vector<64x32xbf16>, vector<16x32xf32> -> vector<16x32xf32>
    %26 = arith.addf %22, %25 : vector<16x32xf32>
    %c0_15 = arith.constant 0 : index
    %c0_16 = arith.constant 0 : index
    %27 = vector.load %arg9[%c0_15, %c0_16] : memref<16x32xf32, #tpu.memory_space<vmem>>, vector<16x32xf32>
    tpu.vector_store %arg9[%c0_15, %c0_16], %26 {strides = array<i32>} : memref<16x32xf32, #tpu.memory_space<vmem>>, vector<16x32xf32>,
    %c0_i32_17 = arith.constant 0 : i32
    %28 = arith.cmpi eq, %arg1, %c0_i32_17 : i32
    %29 = arith.extui %28 : i1 to i32
    %c0_i32_18 = arith.constant 0 : i32
    %30 = arith.cmpi ne, %29, %c0_i32_18 : i32
    scf.if %30 {
      %c0_19 = arith.constant 0 : index
      %c0_20 = arith.constant 0 : index
      %31 = vector.load %arg9[%c0_19, %c0_20] : memref<16x32xf32, #tpu.memory_space<vmem>>, vector<16x32xf32>
      %c0_21 = arith.constant 0 : index
      %c0_22 = arith.constant 0 : index
      %32 = vector.load %arg6[%c0_21, %c0_22] : memref<1x32xf32, #tpu.memory_space<vmem>>, vector<1x32xf32>
      %33 = vector.broadcast %32 : vector<1x32xf32> to vector<16x32xf32>
      %34 = arith.addf %31, %33 : vector<16x32xf32>
      %c0_23 = arith.constant 0 : index
      %c0_24 = arith.constant 0 : index
      %35 = vector.load %arg7[%c0_23, %c0_24] : memref<16x32xbf16, #tpu.memory_space<vmem>>, vector<16x32xbf16>
      %36 = arith.extf %35 : vector<16x32xbf16> to vector<16x32xf32>
      %37 = arith.addf %34, %36 : vector<16x32xf32>
      %38 = arith.truncf %37 : vector<16x32xf32> to vector<16x32xbf16>
      %c0_25 = arith.constant 0 : index
      %c0_26 = arith.constant 0 : index
      %39 = vector.load %arg8[%c0_25, %c0_26] : memref<16x32xbf16, #tpu.memory_space<vmem>>, vector<16x32xbf16>
      tpu.vector_store %arg8[%c0_25, %c0_26], %38 {strides = array<i32>} : memref<16x32xbf16, #tpu.memory_space<vmem>>, vector<16x32xbf16>,
    } else {
    }
    return
  }
  func.func @transform_0(%arg0: i32, %arg1: i32) -> (i32, i32) {
    %c0_i32 = arith.constant 0 : i32
    %c0_i32_0 = arith.constant 0 : i32
    return %arg0, %c0_i32 : i32, i32
  }
  func.func @transform_1(%arg0: i32, %arg1: i32) -> (i32, i32) {
    %c0_i32 = arith.constant 0 : i32
    %c0_i32_0 = arith.constant 0 : i32
    return %c0_i32, %arg1 : i32, i32
  }
  func.func @transform_2(%arg0: i32, %arg1: i32) -> (i32, i32) {
    %c0_i32 = arith.constant 0 : i32
    %c0_i32_0 = arith.constant 0 : i32
    return %c0_i32, %arg1 : i32, i32
  }
  func.func @transform_3(%arg0: i32, %arg1: i32) -> (i32, i32) {
    %c0_i32 = arith.constant 0 : i32
    %c0_i32_0 = arith.constant 0 : i32
    return %arg1, %c0_i32 : i32, i32
  }
  func.func @transform_4(%arg0: i32, %arg1: i32) -> (i32, i32) {
    %c0_i32 = arith.constant 0 : i32
    %c0_i32_0 = arith.constant 0 : i32
    %c0_i32_1 = arith.constant 0 : i32
    return %c0_i32, %c0_i32_0 : i32, i32
  }
  func.func @transform_5(%arg0: i32, %arg1: i32) -> (i32, i32) {
    %c0_i32 = arith.constant 0 : i32
    %c0_i32_0 = arith.constant 0 : i32
    return %arg0, %c0_i32 : i32, i32
  }
  func.func @transform_6(%arg0: i32, %arg1: i32) -> (i32, i32) {
    %c0_i32 = arith.constant 0 : i32
    %c0_i32_0 = arith.constant 0 : i32
    return %arg0, %c0_i32 : i32, i32
  }
}

module attributes {stable_mosaic.version = 11 : i64} {
  func.func @_linear_kernel(%arg0: i32, %arg1: i32, %arg2: i32, %arg3: memref<16x32xbf16, #tpu.memory_space<vmem>>, %arg4: memref<32x64xbf16, #tpu.memory_space<vmem>>, %arg5: memref<1x64xf32, #tpu.memory_space<vmem>>, %arg6: memref<16x64xbf16, #tpu.memory_space<vmem>>, %arg7: memref<16x64xf32, #tpu.memory_space<vmem>>) attributes {dimension_semantics = [#tpu.dimension_semantics<parallel>, #tpu.dimension_semantics<parallel>, #tpu.dimension_semantics<arbitrary>], iteration_bounds = array<i64: 1, 1, 1>, scalar_prefetch = 0 : i64, scratch_operands = 1 : i64, tpu.core_type = #tpu.core_type<tc>, window_params = [{transform_indices = @transform_0, window_bounds = array<i64: 16, 32>}, {transform_indices = @transform_1, window_bounds = array<i64: 32, 64>}, {transform_indices = @transform_2, window_bounds = array<i64: 1, 64>}, {transform_indices = @transform_3, window_bounds = array<i64: 16, 64>}]} {
    %c0_i32 = arith.constant 0 : i32
    %0 = arith.cmpi eq, %arg2, %c0_i32 : i32
    %1 = arith.extui %0 : i1 to i32
    %c0_i32_0 = arith.constant 0 : i32
    %2 = arith.cmpi ne, %1, %c0_i32_0 : i32
    scf.if %2 {
      %cst_10 = arith.constant 0.000000e+00 : f32
      %12 = vector.broadcast %cst_10 : f32 to vector<16x64xf32>
      %c0_11 = arith.constant 0 : index
      %c0_12 = arith.constant 0 : index
      %13 = vector.load %arg7[%c0_11, %c0_12] : memref<16x64xf32, #tpu.memory_space<vmem>>, vector<16x64xf32>
      tpu.vector_store %arg7[%c0_11, %c0_12], %12 {strides = array<i32>} : memref<16x64xf32, #tpu.memory_space<vmem>>, vector<16x64xf32>,
    } else {
    }
    %c0 = arith.constant 0 : index
    %c0_1 = arith.constant 0 : index
    %3 = vector.load %arg7[%c0, %c0_1] : memref<16x64xf32, #tpu.memory_space<vmem>>, vector<16x64xf32>
    %c0_2 = arith.constant 0 : index
    %c0_3 = arith.constant 0 : index
    %4 = vector.load %arg3[%c0_2, %c0_3] : memref<16x32xbf16, #tpu.memory_space<vmem>>, vector<16x32xbf16>
    %c0_4 = arith.constant 0 : index
    %c0_5 = arith.constant 0 : index
    %5 = vector.load %arg4[%c0_4, %c0_5] : memref<32x64xbf16, #tpu.memory_space<vmem>>, vector<32x64xbf16>
    %cst = arith.constant dense<0.000000e+00> : vector<16x64xf32>
    %6 = tpu.matmul %4, %5, %cst {dimension_numbers = #tpu.dot_dimension_numbers<[1], [0], [0], [1], [0, 0, 1, 1], [], []>} : vector<16x32xbf16>, vector<32x64xbf16>, vector<16x64xf32> -> vector<16x64xf32>
    %7 = arith.addf %3, %6 : vector<16x64xf32>
    %c0_6 = arith.constant 0 : index
    %c0_7 = arith.constant 0 : index
    %8 = vector.load %arg7[%c0_6, %c0_7] : memref<16x64xf32, #tpu.memory_space<vmem>>, vector<16x64xf32>
    tpu.vector_store %arg7[%c0_6, %c0_7], %7 {strides = array<i32>} : memref<16x64xf32, #tpu.memory_space<vmem>>, vector<16x64xf32>,
    %c0_i32_8 = arith.constant 0 : i32
    %9 = arith.cmpi eq, %arg2, %c0_i32_8 : i32
    %10 = arith.extui %9 : i1 to i32
    %c0_i32_9 = arith.constant 0 : i32
    %11 = arith.cmpi ne, %10, %c0_i32_9 : i32
    scf.if %11 {
      %c0_10 = arith.constant 0 : index
      %c0_11 = arith.constant 0 : index
      %12 = vector.load %arg7[%c0_10, %c0_11] : memref<16x64xf32, #tpu.memory_space<vmem>>, vector<16x64xf32>
      %c0_12 = arith.constant 0 : index
      %c0_13 = arith.constant 0 : index
      %13 = vector.load %arg5[%c0_12, %c0_13] : memref<1x64xf32, #tpu.memory_space<vmem>>, vector<1x64xf32>
      %14 = vector.broadcast %13 : vector<1x64xf32> to vector<16x64xf32>
      %15 = arith.addf %12, %14 : vector<16x64xf32>
      %16 = arith.truncf %15 : vector<16x64xf32> to vector<16x64xbf16>
      %c0_14 = arith.constant 0 : index
      %c0_15 = arith.constant 0 : index
      %17 = vector.load %arg6[%c0_14, %c0_15] : memref<16x64xbf16, #tpu.memory_space<vmem>>, vector<16x64xbf16>
      tpu.vector_store %arg6[%c0_14, %c0_15], %16 {strides = array<i32>} : memref<16x64xbf16, #tpu.memory_space<vmem>>, vector<16x64xbf16>,
    } else {
    }
    return
  }
  func.func @transform_0(%arg0: i32, %arg1: i32, %arg2: i32) -> (i32, i32) {
    %c0_i32 = arith.constant 0 : i32
    return %arg0, %arg2 : i32, i32
  }
  func.func @transform_1(%arg0: i32, %arg1: i32, %arg2: i32) -> (i32, i32) {
    %c0_i32 = arith.constant 0 : i32
    return %arg2, %arg1 : i32, i32
  }
  func.func @transform_2(%arg0: i32, %arg1: i32, %arg2: i32) -> (i32, i32) {
    %c0_i32 = arith.constant 0 : i32
    %c0_i32_0 = arith.constant 0 : i32
    return %c0_i32, %arg1 : i32, i32
  }
  func.func @transform_3(%arg0: i32, %arg1: i32, %arg2: i32) -> (i32, i32) {
    %c0_i32 = arith.constant 0 : i32
    return %arg0, %arg1 : i32, i32
  }
}

module attributes {stable_mosaic.version = 11 : i64} {
  func.func @_attention_kernel(%arg0: i32, %arg1: i32, %arg2: memref<1x1x8x8xbf16, #tpu.memory_space<vmem>>, %arg3: memref<1x1x8x8xbf16, #tpu.memory_space<vmem>>, %arg4: memref<1x1x8x8xbf16, #tpu.memory_space<vmem>>, %arg5: memref<1x1x8x8xbf16, #tpu.memory_space<vmem>>) attributes {dimension_semantics = [#tpu.dimension_semantics<parallel>, #tpu.dimension_semantics<parallel>], iteration_bounds = array<i64: 2, 4>, scalar_prefetch = 0 : i64, scratch_operands = 0 : i64, tpu.core_type = #tpu.core_type<tc>, window_params = [{transform_indices = @transform_0, window_bounds = array<i64: 1, 1, 8, 8>}, {transform_indices = @transform_1, window_bounds = array<i64: 1, 1, 8, 8>}, {transform_indices = @transform_2, window_bounds = array<i64: 1, 1, 8, 8>}, {transform_indices = @transform_3, window_bounds = array<i64: 1, 1, 8, 8>}]} {
    %c0 = arith.constant 0 : index
    %c0_0 = arith.constant 0 : index
    %c0_1 = arith.constant 0 : index
    %c0_2 = arith.constant 0 : index
    %0 = vector.load %arg2[%c0, %c0_0, %c0_1, %c0_2] : memref<1x1x8x8xbf16, #tpu.memory_space<vmem>>, vector<1x1x8x8xbf16>
    %1 = vector.shape_cast %0 : vector<1x1x8x8xbf16> to vector<8x8xbf16>
    %c0_3 = arith.constant 0 : index
    %c0_4 = arith.constant 0 : index
    %c0_5 = arith.constant 0 : index
    %c0_6 = arith.constant 0 : index
    %2 = vector.load %arg3[%c0_3, %c0_4, %c0_5, %c0_6] : memref<1x1x8x8xbf16, #tpu.memory_space<vmem>>, vector<1x1x8x8xbf16>
    %3 = vector.shape_cast %2 : vector<1x1x8x8xbf16> to vector<8x8xbf16>
    %c0_7 = arith.constant 0 : index
    %c0_8 = arith.constant 0 : index
    %c0_9 = arith.constant 0 : index
    %c0_10 = arith.constant 0 : index
    %4 = vector.load %arg4[%c0_7, %c0_8, %c0_9, %c0_10] : memref<1x1x8x8xbf16, #tpu.memory_space<vmem>>, vector<1x1x8x8xbf16>
    %5 = vector.shape_cast %4 : vector<1x1x8x8xbf16> to vector<8x8xbf16>
    %cst = arith.constant dense<0.000000e+00> : vector<8x8xf32>
    %6 = tpu.matmul %1, %3, %cst {dimension_numbers = #tpu.dot_dimension_numbers<[1], [1], [0], [0], [0, 0, 1, 0], [], []>} : vector<8x8xbf16>, vector<8x8xbf16>, vector<8x8xf32> -> vector<8x8xf32>
    %cst_11 = arith.constant 0.353553385 : f32
    %7 = vector.broadcast %cst_11 : f32 to vector<8x8xf32>
    %8 = arith.mulf %6, %7 : vector<8x8xf32>
    %9 = tpu.iota {dimensions = array<i32: 0>} : vector<8x8xi32>
    %10 = tpu.iota {dimensions = array<i32: 1>} : vector<8x8xi32>
    %11 = arith.cmpi sge, %9, %10 : vector<8x8xi32>
    %cst_12 = arith.constant -1.000000e+30 : f32
    %12 = vector.broadcast %cst_12 : f32 to vector<8x8xf32>
    %13 = arith.select %11, %8, %12 : vector<8x8xi1>, vector<8x8xf32>
    %cst_13 = arith.constant dense<0xFF800000> : vector<8xf32>
    %14 = vector.multi_reduction <maximumf>, %13, %cst_13 [1] : vector<8x8xf32> to vector<8xf32>
    %15 = vector.shape_cast %14 : vector<8xf32> to vector<8x1xf32>
    %16 = vector.broadcast %15 : vector<8x1xf32> to vector<8x8xf32>
    %17 = arith.subf %13, %16 : vector<8x8xf32>
    %18 = math.exp %17 : vector<8x8xf32>
    %cst_14 = arith.constant dense<0.000000e+00> : vector<8xf32>
    %19 = vector.multi_reduction <add>, %18, %cst_14 [1] : vector<8x8xf32> to vector<8xf32>
    %20 = vector.shape_cast %19 : vector<8xf32> to vector<8x1xf32>
    %21 = tpu.reciprocal %20 {approx = true} : vector<8x1xf32> -> vector<8x1xf32>
    %22 = vector.broadcast %21 : vector<8x1xf32> to vector<8x8xf32>
    %23 = arith.mulf %18, %22 : vector<8x8xf32>
    %24 = arith.truncf %23 : vector<8x8xf32> to vector<8x8xbf16>
    %cst_15 = arith.constant dense<0.000000e+00> : vector<8x8xf32>
    %25 = tpu.matmul %24, %5, %cst_15 {dimension_numbers = #tpu.dot_dimension_numbers<[1], [0], [0], [1], [0, 0, 1, 1], [], []>} : vector<8x8xbf16>, vector<8x8xbf16>, vector<8x8xf32> -> vector<8x8xf32>
    %26 = arith.truncf %25 : vector<8x8xf32> to vector<8x8xbf16>
    %c0_16 = arith.constant 0 : index
    %c0_17 = arith.constant 0 : index
    %c0_18 = arith.constant 0 : index
    %c0_19 = arith.constant 0 : index
    %27 = vector.load %arg5[%c0_16, %c0_17, %c0_18, %c0_19] : memref<1x1x8x8xbf16, #tpu.memory_space<vmem>>, vector<1x1x8x8xbf16>
    %28 = vector.shape_cast %27 : vector<1x1x8x8xbf16> to vector<8x8xbf16>
    %29 = vector.shape_cast %26 : vector<8x8xbf16> to vector<1x1x8x8xbf16>
    tpu.vector_store %arg5[%c0_16, %c0_17, %c0_18, %c0_19], %29 {strides = array<i32>} : memref<1x1x8x8xbf16, #tpu.memory_space<vmem>>, vector<1x1x8x8xbf16>,
    return
  }
  func.func @transform_0(%arg0: i32, %arg1: i32) -> (i32, i32, i32, i32) {
    %c0_i32 = arith.constant 0 : i32
    %c0_i32_0 = arith.constant 0 : i32
    %c0_i32_1 = arith.constant 0 : i32
    return %arg0, %arg1, %c0_i32, %c0_i32_0 : i32, i32, i32, i32
  }
  func.func @transform_1(%arg0: i32, %arg1: i32) -> (i32, i32, i32, i32) {
    %c0_i32 = arith.constant 0 : i32
    %c0_i32_0 = arith.constant 0 : i32
    %c0_i32_1 = arith.constant 0 : i32
    return %arg0, %arg1, %c0_i32, %c0_i32_0 : i32, i32, i32, i32
  }
  func.func @transform_2(%arg0: i32, %arg1: i32) -> (i32, i32, i32, i32) {
    %c0_i32 = arith.constant 0 : i32
    %c0_i32_0 = arith.constant 0 : i32
    %c0_i32_1 = arith.constant 0 : i32
    return %arg0, %arg1, %c0_i32, %c0_i32_0 : i32, i32, i32, i32
  }
  func.func @transform_3(%arg0: i32, %arg1: i32) -> (i32, i32, i32, i32) {
    %c0_i32 = arith.constant 0 : i32
    %c0_i32_0 = arith.constant 0 : i32
    %c0_i32_1 = arith.constant 0 : i32
    return %arg0, %arg1, %c0_i32, %c0_i32_0 : i32, i32, i32, i32
  }
}

module attributes {stable_mosaic.version = 11 : i64} {
  func.func @_linear_kernel(%arg0: i32, %arg1: i32, %arg2: i32, %arg3: memref<16x32xbf16, #tpu.memory_space<vmem>>, %arg4: memref<32x32xbf16, #tpu.memory_space<vmem>>, %arg5: memref<1x32xf32, #tpu.memory_space<vmem>>, %arg6: memref<16x32xbf16, #tpu.memory_space<vmem>>, %arg7: memref<16x32xf32, #tpu.memory_space<vmem>>) attributes {dimension_semantics = [#tpu.dimension_semantics<parallel>, #tpu.dimension_semantics<parallel>, #tpu.dimension_semantics<arbitrary>], iteration_bounds = array<i64: 1, 1, 1>, scalar_prefetch = 0 : i64, scratch_operands = 1 : i64, tpu.core_type = #tpu.core_type<tc>, window_params = [{transform_indices = @transform_0, window_bounds = array<i64: 16, 32>}, {transform_indices = @transform_1, window_bounds = array<i64: 32, 32>}, {transform_indices = @transform_2, window_bounds = array<i64: 1, 32>}, {transform_indices = @transform_3, window_bounds = array<i64: 16, 32>}]} {
    %c0_i32 = arith.constant 0 : i32
    %0 = arith.cmpi eq, %arg2, %c0_i32 : i32
    %1 = arith.extui %0 : i1 to i32
    %c0_i32_0 = arith.constant 0 : i32
    %2 = arith.cmpi ne, %1, %c0_i32_0 : i32
    scf.if %2 {
      %cst_10 = arith.constant 0.000000e+00 : f32
      %12 = vector.broadcast %cst_10 : f32 to vector<16x32xf32>
      %c0_11 = arith.constant 0 : index
      %c0_12 = arith.constant 0 : index
      %13 = vector.load %arg7[%c0_11, %c0_12] : memref<16x32xf32, #tpu.memory_space<vmem>>, vector<16x32xf32>
      tpu.vector_store %arg7[%c0_11, %c0_12], %12 {strides = array<i32>} : memref<16x32xf32, #tpu.memory_space<vmem>>, vector<16x32xf32>,
    } else {
    }
    %c0 = arith.constant 0 : index
    %c0_1 = arith.constant 0 : index
    %3 = vector.load %arg7[%c0, %c0_1] : memref<16x32xf32, #tpu.memory_space<vmem>>, vector<16x32xf32>
    %c0_2 = arith.constant 0 : index
    %c0_3 = arith.constant 0 : index
    %4 = vector.load %arg3[%c0_2, %c0_3] : memref<16x32xbf16, #tpu.memory_space<vmem>>, vector<16x32xbf16>
    %c0_4 = arith.constant 0 : index
    %c0_5 = arith.constant 0 : index
    %5 = vector.load %arg4[%c0_4, %c0_5] : memref<32x32xbf16, #tpu.memory_space<vmem>>, vector<32x32xbf16>
    %cst = arith.constant dense<0.000000e+00> : vector<16x32xf32>
    %6 = tpu.matmul %4, %5, %cst {dimension_numbers = #tpu.dot_dimension_numbers<[1], [0], [0], [1], [0, 0, 1, 1], [], []>} : vector<16x32xbf16>, vector<32x32xbf16>, vector<16x32xf32> -> vector<16x32xf32>
    %7 = arith.addf %3, %6 : vector<16x32xf32>
    %c0_6 = arith.constant 0 : index
    %c0_7 = arith.constant 0 : index
    %8 = vector.load %arg7[%c0_6, %c0_7] : memref<16x32xf32, #tpu.memory_space<vmem>>, vector<16x32xf32>
    tpu.vector_store %arg7[%c0_6, %c0_7], %7 {strides = array<i32>} : memref<16x32xf32, #tpu.memory_space<vmem>>, vector<16x32xf32>,
    %c0_i32_8 = arith.constant 0 : i32
    %9 = arith.cmpi eq, %arg2, %c0_i32_8 : i32
    %10 = arith.extui %9 : i1 to i32
    %c0_i32_9 = arith.constant 0 : i32
    %11 = arith.cmpi ne, %10, %c0_i32_9 : i32
    scf.if %11 {
      %c0_10 = arith.constant 0 : index
      %c0_11 = arith.constant 0 : index
      %12 = vector.load %arg7[%c0_10, %c0_11] : memref<16x32xf32, #tpu.memory_space<vmem>>, vector<16x32xf32>
      %c0_12 = arith.constant 0 : index
      %c0_13 = arith.constant 0 : index
      %13 = vector.load %arg5[%c0_12, %c0_13] : memref<1x32xf32, #tpu.memory_space<vmem>>, vector<1x32xf32>
      %14 = vector.broadcast %13 : vector<1x32xf32> to vector<16x32xf32>
      %15 = arith.addf %12, %14 : vector<16x32xf32>
      %16 = arith.truncf %15 : vector<16x32xf32> to vector<16x32xbf16>
      %c0_14 = arith.constant 0 : index
      %c0_15 = arith.constant 0 : index
      %17 = vector.load %arg6[%c0_14, %c0_15] : memref<16x32xbf16, #tpu.memory_space<vmem>>, vector<16x32xbf16>
      tpu.vector_store %arg6[%c0_14, %c0_15], %16 {strides = array<i32>} : memref<16x32xbf16, #tpu.memory_space<vmem>>, vector<16x32xbf16>,
    } else {
    }
    return
  }
  func.func @transform_0(%arg0: i32, %arg1: i32, %arg2: i32) -> (i32, i32) {
    %c0_i32 = arith.constant 0 : i32
    return %arg0, %arg2 : i32, i32
  }
  func.func @transform_1(%arg0: i32, %arg1: i32, %arg2: i32) -> (i32, i32) {
    %c0_i32 = arith.constant 0 : i32
    return %arg2, %arg1 : i32, i32
  }
  func.func @transform_2(%arg0: i32, %arg1: i32, %arg2: i32) -> (i32, i32) {
    %c0_i32 = arith.constant 0 : i32
    %c0_i32_0 = arith.constant 0 : i32
    return %c0_i32, %arg1 : i32, i32
  }
  func.func @transform_3(%arg0: i32, %arg1: i32, %arg2: i32) -> (i32, i32) {
    %c0_i32 = arith.constant 0 : i32
    return %arg0, %arg1 : i32, i32
  }
}

module attributes {stable_mosaic.version = 11 : i64} {
  func.func @_layernorm_kernel(%arg0: i32, %arg1: memref<16x32xbf16, #tpu.memory_space<vmem>>, %arg2: memref<16x32xbf16, #tpu.memory_space<vmem>>, %arg3: memref<1x32xf32, #tpu.memory_space<vmem>>, %arg4: memref<1x32xf32, #tpu.memory_space<vmem>>, %arg5: memref<16x32xbf16, #tpu.memory_space<vmem>>) attributes {dimension_semantics = [#tpu.dimension_semantics<parallel>], iteration_bounds = array<i64: 1>, scalar_prefetch = 0 : i64, scratch_operands = 0 : i64, tpu.core_type = #tpu.core_type<tc>, window_params = [{transform_indices = @transform_0, window_bounds = array<i64: 16, 32>}, {transform_indices = @transform_1, window_bounds = array<i64: 16, 32>}, {pipeline_mode = #tpu.pipeline_mode<synchronous>, transform_indices = @transform_2, window_bounds = array<i64: 1, 32>}, {pipeline_mode = #tpu.pipeline_mode<synchronous>, transform_indices = @transform_3, window_bounds = array<i64: 1, 32>}, {transform_indices = @transform_4, window_bounds = array<i64: 16, 32>}]} {
    %c0 = arith.constant 0 : index
    %c0_0 = arith.constant 0 : index
    %0 = vector.load %arg1[%c0, %c0_0] : memref<16x32xbf16, #tpu.memory_space<vmem>>, vector<16x32xbf16>
    %1 = arith.extf %0 : vector<16x32xbf16> to vector<16x32xf32>
    %c0_1 = arith.constant 0 : index
    %c0_2 = arith.constant 0 : index
    %2 = vector.load %arg2[%c0_1, %c0_2] : memref<16x32xbf16, #tpu.memory_space<vmem>>, vector<16x32xbf16>
    %3 = arith.extf %2 : vector<16x32xbf16> to vector<16x32xf32>
    %4 = arith.addf %1, %3 : vector<16x32xf32>
    %cst = arith.constant dense<0.000000e+00> : vector<16xf32>
    %5 = vector.multi_reduction <add>, %4, %cst [1] : vector<16x32xf32> to vector<16xf32>
    %6 = vector.shape_cast %5 : vector<16xf32> to vector<16x1xf32>
    %cst_3 = arith.constant 3.200000e+01 : f32
    %7 = vector.broadcast %cst_3 : f32 to vector<16x1xf32>
    %8 = arith.divf %6, %7 : vector<16x1xf32>
    %9 = vector.broadcast %8 : vector<16x1xf32> to vector<16x32xf32>
    %10 = arith.subf %4, %9 : vector<16x32xf32>
    %11 = arith.mulf %10, %10 : vector<16x32xf32>
    %cst_4 = arith.constant dense<0.000000e+00> : vector<16xf32>
    %12 = vector.multi_reduction <add>, %11, %cst_4 [1] : vector<16x32xf32> to vector<16xf32>
    %13 = vector.shape_cast %12 : vector<16xf32> to vector<16x1xf32>
    %cst_5 = arith.constant 3.200000e+01 : f32
    %14 = vector.broadcast %cst_5 : f32 to vector<16x1xf32>
    %15 = arith.divf %13, %14 : vector<16x1xf32>
    %16 = vector.broadcast %8 : vector<16x1xf32> to vector<16x32xf32>
    %17 = arith.subf %4, %16 : vector<16x32xf32>
    %cst_6 = arith.constant 9.99999974E-6 : f32
    %18 = vector.broadcast %cst_6 : f32 to vector<16x1xf32>
    %19 = arith.addf %15, %18 : vector<16x1xf32>
    %20 = math.rsqrt %19 : vector<16x1xf32>
    %21 = vector.broadcast %20 : vector<16x1xf32> to vector<16x32xf32>
    %22 = arith.mulf %17, %21 : vector<16x32xf32>
    %c0_7 = arith.constant 0 : index
    %c0_8 = arith.constant 0 : index
    %23 = vector.load %arg3[%c0_7, %c0_8] : memref<1x32xf32, #tpu.memory_space<vmem>>, vector<1x32xf32>
    %24 = vector.broadcast %23 : vector<1x32xf32> to vector<16x32xf32>
    %25 = arith.mulf %22, %24 : vector<16x32xf32>
    %c0_9 = arith.constant 0 : index
    %c0_10 = arith.constant 0 : index
    %26 = vector.load %arg4[%c0_9, %c0_10] : memref<1x32xf32, #tpu.memory_space<vmem>>, vector<1x32xf32>
    %27 = vector.broadcast %26 : vector<1x32xf32> to vector<16x32xf32>
    %28 = arith.addf %25, %27 : vector<16x32xf32>
    %29 = arith.truncf %28 : vector<16x32xf32> to vector<16x32xbf16>
    %c0_11 = arith.constant 0 : index
    %c0_12 = arith.constant 0 : index
    %30 = vector.load %arg5[%c0_11, %c0_12] : memref<16x32xbf16, #tpu.memory_space<vmem>>, vector<16x32xbf16>
    tpu.vector_store %arg5[%c0_11, %c0_12], %29 {strides = array<i32>} : memref<16x32xbf16, #tpu.memory_space<vmem>>, vector<16x32xbf16>,
    return
  }
  func.func @transform_0(%arg0: i32) -> (i32, i32) {
    %c0_i32 = arith.constant 0 : i32
    %c0_i32_0 = arith.constant 0 : i32
    return %arg0, %c0_i32 : i32, i32
  }
  func.func @transform_1(%arg0: i32) -> (i32, i32) {
    %c0_i32 = arith.constant 0 : i32
    %c0_i32_0 = arith.constant 0 : i32
    return %arg0, %c0_i32 : i32, i32
  }
  func.func @transform_2(%arg0: i32) -> (i32, i32) {
    %c0_i32 = arith.constant 0 : i32
    %c0_i32_0 = arith.constant 0 : i32
    %c0_i32_1 = arith.constant 0 : i32
    return %c0_i32, %c0_i32_0 : i32, i32
  }
  func.func @transform_3(%arg0: i32) -> (i32, i32) {
    %c0_i32 = arith.constant 0 : i32
    %c0_i32_0 = arith.constant 0 : i32
    %c0_i32_1 = arith.constant 0 : i32
    return %c0_i32, %c0_i32_0 : i32, i32
  }
  func.func @transform_4(%arg0: i32) -> (i32, i32) {
    %c0_i32 = arith.constant 0 : i32
    %c0_i32_0 = arith.constant 0 : i32
    return %arg0, %c0_i32 : i32, i32
  }
}

module attributes {stable_mosaic.version = 11 : i64} {
  func.func @_attention_kernel(%arg0: i32, %arg1: i32, %arg2: memref<1x1x8x8xbf16, #tpu.memory_space<vmem>>, %arg3: memref<1x1x5x8xbf16, #tpu.memory_space<vmem>>, %arg4: memref<1x1x5x8xbf16, #tpu.memory_space<vmem>>, %arg5: memref<1x1x8x8xbf16, #tpu.memory_space<vmem>>) attributes {dimension_semantics = [#tpu.dimension_semantics<parallel>, #tpu.dimension_semantics<parallel>], iteration_bounds = array<i64: 2, 4>, scalar_prefetch = 0 : i64, scratch_operands = 0 : i64, tpu.core_type = #tpu.core_type<tc>, window_params = [{transform_indices = @transform_0, window_bounds = array<i64: 1, 1, 8, 8>}, {transform_indices = @transform_1, window_bounds = array<i64: 1, 1, 5, 8>}, {transform_indices = @transform_2, window_bounds = array<i64: 1, 1, 5, 8>}, {transform_indices = @transform_3, window_bounds = array<i64: 1, 1, 8, 8>}]} {
    %c0 = arith.constant 0 : index
    %c0_0 = arith.constant 0 : index
    %c0_1 = arith.constant 0 : index
    %c0_2 = arith.constant 0 : index
    %0 = vector.load %arg2[%c0, %c0_0, %c0_1, %c0_2] : memref<1x1x8x8xbf16, #tpu.memory_space<vmem>>, vector<1x1x8x8xbf16>
    %1 = vector.shape_cast %0 : vector<1x1x8x8xbf16> to vector<8x8xbf16>
    %c0_3 = arith.constant 0 : index
    %c0_4 = arith.constant 0 : index
    %c0_5 = arith.constant 0 : index
    %c0_6 = arith.constant 0 : index
    %2 = vector.load %arg3[%c0_3, %c0_4, %c0_5, %c0_6] : memref<1x1x5x8xbf16, #tpu.memory_space<vmem>>, vector<1x1x5x8xbf16>
    %3 = vector.shape_cast %2 : vector<1x1x5x8xbf16> to vector<5x8xbf16>
    %c0_7 = arith.constant 0 : index
    %c0_8 = arith.constant 0 : index
    %c0_9 = arith.constant 0 : index
    %c0_10 = arith.constant 0 : index
    %4 = vector.load %arg4[%c0_7, %c0_8, %c0_9, %c0_10] : memref<1x1x5x8xbf16, #tpu.memory_space<vmem>>, vector<1x1x5x8xbf16>
    %5 = vector.shape_cast %4 : vector<1x1x5x8xbf16> to vector<5x8xbf16>
    %cst = arith.constant dense<0.000000e+00> : vector<8x5xf32>
    %6 = tpu.matmul %1, %3, %cst {dimension_numbers = #tpu.dot_dimension_numbers<[1], [1], [0], [0], [0, 0, 1, 0], [], []>} : vector<8x8xbf16>, vector<5x8xbf16>, vector<8x5xf32> -> vector<8x5xf32>
    %cst_11 = arith.constant 0.353553385 : f32
    %7 = vector.broadcast %cst_11 : f32 to vector<8x5xf32>
    %8 = arith.mulf %6, %7 : vector<8x5xf32>
    %cst_12 = arith.constant dense<0xFF800000> : vector<8xf32>
    %9 = vector.multi_reduction <maximumf>, %8, %cst_12 [1] : vector<8x5xf32> to vector<8xf32>
    %10 = vector.shape_cast %9 : vector<8xf32> to vector<8x1xf32>
    %11 = vector.broadcast %10 : vector<8x1xf32> to vector<8x5xf32>
    %12 = arith.subf %8, %11 : vector<8x5xf32>
    %13 = math.exp %12 : vector<8x5xf32>
    %cst_13 = arith.constant dense<0.000000e+00> : vector<8xf32>
    %14 = vector.multi_reduction <add>, %13, %cst_13 [1] : vector<8x5xf32> to vector<8xf32>
    %15 = vector.shape_cast %14 : vector<8xf32> to vector<8x1xf32>
    %16 = tpu.reciprocal %15 {approx = true} : vector<8x1xf32> -> vector<8x1xf32>
    %17 = vector.broadcast %16 : vector<8x1xf32> to vector<8x5xf32>
    %18 = arith.mulf %13, %17 : vector<8x5xf32>
    %19 = arith.truncf %18 : vector<8x5xf32> to vector<8x5xbf16>
    %cst_14 = arith.constant dense<0.000000e+00> : vector<8x8xf32>
    %20 = tpu.matmul %19, %5, %cst_14 {dimension_numbers = #tpu.dot_dimension_numbers<[1], [0], [0], [1], [0, 0, 1, 1], [], []>} : vector<8x5xbf16>, vector<5x8xbf16>, vector<8x8xf32> -> vector<8x8xf32>
    %21 = arith.truncf %20 : vector<8x8xf32> to vector<8x8xbf16>
    %c0_15 = arith.constant 0 : index
    %c0_16 = arith.constant 0 : index
    %c0_17 = arith.constant 0 : index
    %c0_18 = arith.constant 0 : index
    %22 = vector.load %arg5[%c0_15, %c0_16, %c0_17, %c0_18] : memref<1x1x8x8xbf16, #tpu.memory_space<vmem>>, vector<1x1x8x8xbf16>
    %23 = vector.shape_cast %22 : vector<1x1x8x8xbf16> to vector<8x8xbf16>
    %24 = vector.shape_cast %21 : vector<8x8xbf16> to vector<1x1x8x8xbf16>
    tpu.vector_store %arg5[%c0_15, %c0_16, %c0_17, %c0_18], %24 {strides = array<i32>} : memref<1x1x8x8xbf16, #tpu.memory_space<vmem>>, vector<1x1x8x8xbf16>,
    return
  }
  func.func @transform_0(%arg0: i32, %arg1: i32) -> (i32, i32, i32, i32) {
    %c0_i32 = arith.constant 0 : i32
    %c0_i32_0 = arith.constant 0 : i32
    %c0_i32_1 = arith.constant 0 : i32
    return %arg0, %arg1, %c0_i32, %c0_i32_0 : i32, i32, i32, i32
  }
  func.func @transform_1(%arg0: i32, %arg1: i32) -> (i32, i32, i32, i32) {
    %c0_i32 = arith.constant 0 : i32
    %c0_i32_0 = arith.constant 0 : i32
    %c0_i32_1 = arith.constant 0 : i32
    return %arg0, %arg1, %c0_i32, %c0_i32_0 : i32, i32, i32, i32
  }
  func.func @transform_2(%arg0: i32, %arg1: i32) -> (i32, i32, i32, i32) {
    %c0_i32 = arith.constant 0 : i32
    %c0_i32_0 = arith.constant 0 : i32
    %c0_i32_1 = arith.constant 0 : i32
    return %arg0, %arg1, %c0_i32, %c0_i32_0 : i32, i32, i32, i32
  }
  func.func @transform_3(%arg0: i32, %arg1: i32) -> (i32, i32, i32, i32) {
    %c0_i32 = arith.constant 0 : i32
    %c0_i32_0 = arith.constant 0 : i32
    %c0_i32_1 = arith.constant 0 : i32
    return %arg0, %arg1, %c0_i32, %c0_i32_0 : i32, i32, i32, i32
  }
}

module attributes {stable_mosaic.version = 11 : i64} {
  func.func @_linear_kernel(%arg0: i32, %arg1: i32, %arg2: i32, %arg3: memref<16x32xbf16, #tpu.memory_space<vmem>>, %arg4: memref<32x128xbf16, #tpu.memory_space<vmem>>, %arg5: memref<1x128xf32, #tpu.memory_space<vmem>>, %arg6: memref<16x128xf32, #tpu.memory_space<vmem>>, %arg7: memref<16x128xf32, #tpu.memory_space<vmem>>) attributes {dimension_semantics = [#tpu.dimension_semantics<parallel>, #tpu.dimension_semantics<parallel>, #tpu.dimension_semantics<arbitrary>], iteration_bounds = array<i64: 1, 1, 1>, scalar_prefetch = 0 : i64, scratch_operands = 1 : i64, tpu.core_type = #tpu.core_type<tc>, window_params = [{transform_indices = @transform_0, window_bounds = array<i64: 16, 32>}, {transform_indices = @transform_1, window_bounds = array<i64: 32, 128>}, {transform_indices = @transform_2, window_bounds = array<i64: 1, 128>}, {transform_indices = @transform_3, window_bounds = array<i64: 16, 128>}]} {
    %c0_i32 = arith.constant 0 : i32
    %0 = arith.cmpi eq, %arg2, %c0_i32 : i32
    %1 = arith.extui %0 : i1 to i32
    %c0_i32_0 = arith.constant 0 : i32
    %2 = arith.cmpi ne, %1, %c0_i32_0 : i32
    scf.if %2 {
      %cst_10 = arith.constant 0.000000e+00 : f32
      %12 = vector.broadcast %cst_10 : f32 to vector<16x128xf32>
      %c0_11 = arith.constant 0 : index
      %c0_12 = arith.constant 0 : index
      %13 = vector.load %arg7[%c0_11, %c0_12] : memref<16x128xf32, #tpu.memory_space<vmem>>, vector<16x128xf32>
      tpu.vector_store %arg7[%c0_11, %c0_12], %12 {strides = array<i32>} : memref<16x128xf32, #tpu.memory_space<vmem>>, vector<16x128xf32>,
    } else {
    }
    %c0 = arith.constant 0 : index
    %c0_1 = arith.constant 0 : index
    %3 = vector.load %arg7[%c0, %c0_1] : memref<16x128xf32, #tpu.memory_space<vmem>>, vector<16x128xf32>
    %c0_2 = arith.constant 0 : index
    %c0_3 = arith.constant 0 : index
    %4 = vector.load %arg3[%c0_2, %c0_3] : memref<16x32xbf16, #tpu.memory_space<vmem>>, vector<16x32xbf16>
    %c0_4 = arith.constant 0 : index
    %c0_5 = arith.constant 0 : index
    %5 = vector.load %arg4[%c0_4, %c0_5] : memref<32x128xbf16, #tpu.memory_space<vmem>>, vector<32x128xbf16>
    %cst = arith.constant dense<0.000000e+00> : vector<16x128xf32>
    %6 = tpu.matmul %4, %5, %cst {dimension_numbers = #tpu.dot_dimension_numbers<[1], [0], [0], [1], [0, 0, 1, 1], [], []>} : vector<16x32xbf16>, vector<32x128xbf16>, vector<16x128xf32> -> vector<16x128xf32>
    %7 = arith.addf %3, %6 : vector<16x128xf32>
    %c0_6 = arith.constant 0 : index
    %c0_7 = arith.constant 0 : index
    %8 = vector.load %arg7[%c0_6, %c0_7] : memref<16x128xf32, #tpu.memory_space<vmem>>, vector<16x128xf32>
    tpu.vector_store %arg7[%c0_6, %c0_7], %7 {strides = array<i32>} : memref<16x128xf32, #tpu.memory_space<vmem>>, vector<16x128xf32>,
    %c0_i32_8 = arith.constant 0 : i32
    %9 = arith.cmpi eq, %arg2, %c0_i32_8 : i32
    %10 = arith.extui %9 : i1 to i32
    %c0_i32_9 = arith.constant 0 : i32
    %11 = arith.cmpi ne, %10, %c0_i32_9 : i32
    scf.if %11 {
      %c0_10 = arith.constant 0 : index
      %c0_11 = arith.constant 0 : index
      %12 = vector.load %arg7[%c0_10, %c0_11] : memref<16x128xf32, #tpu.memory_space<vmem>>, vector<16x128xf32>
      %c0_12 = arith.constant 0 : index
      %c0_13 = arith.constant 0 : index
      %13 = vector.load %arg5[%c0_12, %c0_13] : memref<1x128xf32, #tpu.memory_space<vmem>>, vector<1x128xf32>
      %14 = vector.broadcast %13 : vector<1x128xf32> to vector<16x128xf32>
      %15 = arith.addf %12, %14 : vector<16x128xf32>
      %c0_14 = arith.constant 0 : index
      %c0_15 = arith.constant 0 : index
      %16 = vector.load %arg6[%c0_14, %c0_15] : memref<16x128xf32, #tpu.memory_space<vmem>>, vector<16x128xf32>
      tpu.vector_store %arg6[%c0_14, %c0_15], %15 {strides = array<i32>} : memref<16x128xf32, #tpu.memory_space<vmem>>, vector<16x128xf32>,
    } else {
    }
    return
  }
  func.func @transform_0(%arg0: i32, %arg1: i32, %arg2: i32) -> (i32, i32) {
    %c0_i32 = arith.constant 0 : i32
    return %arg0, %arg2 : i32, i32
  }
  func.func @transform_1(%arg0: i32, %arg1: i32, %arg2: i32) -> (i32, i32) {
    %c0_i32 = arith.constant 0 : i32
    return %arg2, %arg1 : i32, i32
  }
  func.func @transform_2(%arg0: i32, %arg1: i32, %arg2: i32) -> (i32, i32) {
    %c0_i32 = arith.constant 0 : i32
    %c0_i32_0 = arith.constant 0 : i32
    return %c0_i32, %arg1 : i32, i32
  }
  func.func @transform_3(%arg0: i32, %arg1: i32, %arg2: i32) -> (i32, i32) {
    %c0_i32 = arith.constant 0 : i32
    return %arg0, %arg1 : i32, i32
  }
}

module attributes {stable_mosaic.version = 11 : i64} {
  func.func @_mlp_kernel(%arg0: i32, %arg1: i32, %arg2: memref<16x32xbf16, #tpu.memory_space<vmem>>, %arg3: memref<32x64xbf16, #tpu.memory_space<vmem>>, %arg4: memref<1x64xf32, #tpu.memory_space<vmem>>, %arg5: memref<64x32xbf16, #tpu.memory_space<vmem>>, %arg6: memref<1x32xf32, #tpu.memory_space<vmem>>, %arg7: memref<16x32xbf16, #tpu.memory_space<vmem>>, %arg8: memref<16x32xf32, #tpu.memory_space<vmem>>) attributes {dimension_semantics = [#tpu.dimension_semantics<parallel>, #tpu.dimension_semantics<arbitrary>], iteration_bounds = array<i64: 1, 1>, scalar_prefetch = 0 : i64, scratch_operands = 1 : i64, tpu.core_type = #tpu.core_type<tc>, window_params = [{transform_indices = @transform_0, window_bounds = array<i64: 16, 32>}, {transform_indices = @transform_1, window_bounds = array<i64: 32, 64>}, {transform_indices = @transform_2, window_bounds = array<i64: 1, 64>}, {transform_indices = @transform_3, window_bounds = array<i64: 64, 32>}, {pipeline_mode = #tpu.pipeline_mode<synchronous>, transform_indices = @transform_4, window_bounds = array<i64: 1, 32>}, {transform_indices = @transform_5, window_bounds = array<i64: 16, 32>}]} {
    %c0_i32 = arith.constant 0 : i32
    %0 = arith.cmpi eq, %arg1, %c0_i32 : i32
    %1 = arith.extui %0 : i1 to i32
    %c0_i32_0 = arith.constant 0 : i32
    %2 = arith.cmpi ne, %1, %c0_i32_0 : i32
    scf.if %2 {
      %cst_16 = arith.constant 0.000000e+00 : f32
      %20 = vector.broadcast %cst_16 : f32 to vector<16x32xf32>
      %c0_17 = arith.constant 0 : index
      %c0_18 = arith.constant 0 : index
      %21 = vector.load %arg8[%c0_17, %c0_18] : memref<16x32xf32, #tpu.memory_space<vmem>>, vector<16x32xf32>
      tpu.vector_store %arg8[%c0_17, %c0_18], %20 {strides = array<i32>} : memref<16x32xf32, #tpu.memory_space<vmem>>, vector<16x32xf32>,
    } else {
    }
    %c0 = arith.constant 0 : index
    %c0_1 = arith.constant 0 : index
    %3 = vector.load %arg2[%c0, %c0_1] : memref<16x32xbf16, #tpu.memory_space<vmem>>, vector<16x32xbf16>
    %c0_2 = arith.constant 0 : index
    %c0_3 = arith.constant 0 : index
    %4 = vector.load %arg3[%c0_2, %c0_3] : memref<32x64xbf16, #tpu.memory_space<vmem>>, vector<32x64xbf16>
    %cst = arith.constant dense<0.000000e+00> : vector<16x64xf32>
    %5 = tpu.matmul %3, %4, %cst {dimension_numbers = #tpu.dot_dimension_numbers<[1], [0], [0], [1], [0, 0, 1, 1], [], []>} : vector<16x32xbf16>, vector<32x64xbf16>, vector<16x64xf32> -> vector<16x64xf32>
    %c0_4 = arith.constant 0 : index
    %c0_5 = arith.constant 0 : index
    %6 = vector.load %arg4[%c0_4, %c0_5] : memref<1x64xf32, #tpu.memory_space<vmem>>, vector<1x64xf32>
    %7 = vector.broadcast %6 : vector<1x64xf32> to vector<16x64xf32>
    %8 = arith.addf %5, %7 : vector<16x64xf32>
    %cst_6 = arith.constant 0.000000e+00 : f32
    %9 = vector.broadcast %cst_6 : f32 to vector<16x64xf32>
    %10 = arith.maximumf %8, %9 : vector<16x64xf32>
    %c0_7 = arith.constant 0 : index
    %c0_8 = arith.constant 0 : index
    %11 = vector.load %arg8[%c0_7, %c0_8] : memref<16x32xf32, #tpu.memory_space<vmem>>, vector<16x32xf32>
    %12 = arith.truncf %10 : vector<16x64xf32> to vector<16x64xbf16>
    %c0_9 = arith.constant 0 : index
    %c0_10 = arith.constant 0 : index
    %13 = vector.load %arg5[%c0_9, %c0_10] : memref<64x32xbf16, #tpu.memory_space<vmem>>, vector<64x32xbf16>
    %cst_11 = arith.constant dense<0.000000e+00> : vector<16x32xf32>
    %14 = tpu.matmul %12, %13, %cst_11 {dimension_numbers = #tpu.dot_dimension_numbers<[1], [0], [0], [1], [0, 0, 1, 1], [], []>} : vector<16x64xbf16>, vector<64x32xbf16>, vector<16x32xf32> -> vector<16x32xf32>
    %15 = arith.addf %11, %14 : vector<16x32xf32>
    %c0_12 = arith.constant 0 : index
    %c0_13 = arith.constant 0 : index
    %16 = vector.load %arg8[%c0_12, %c0_13] : memref<16x32xf32, #tpu.memory_space<vmem>>, vector<16x32xf32>
    tpu.vector_store %arg8[%c0_12, %c0_13], %15 {strides = array<i32>} : memref<16x32xf32, #tpu.memory_space<vmem>>, vector<16x32xf32>,
    %c0_i32_14 = arith.constant 0 : i32
    %17 = arith.cmpi eq, %arg1, %c0_i32_14 : i32
    %18 = arith.extui %17 : i1 to i32
    %c0_i32_15 = arith.constant 0 : i32
    %19 = arith.cmpi ne, %18, %c0_i32_15 : i32
    scf.if %19 {
      %c0_16 = arith.constant 0 : index
      %c0_17 = arith.constant 0 : index
      %20 = vector.load %arg8[%c0_16, %c0_17] : memref<16x32xf32, #tpu.memory_space<vmem>>, vector<16x32xf32>
      %c0_18 = arith.constant 0 : index
      %c0_19 = arith.constant 0 : index
      %21 = vector.load %arg6[%c0_18, %c0_19] : memref<1x32xf32, #tpu.memory_space<vmem>>, vector<1x32xf32>
      %22 = vector.broadcast %21 : vector<1x32xf32> to vector<16x32xf32>
      %23 = arith.addf %20, %22 : vector<16x32xf32>
      %24 = arith.truncf %23 : vector<16x32xf32> to vector<16x32xbf16>
      %c0_20 = arith.constant 0 : index
      %c0_21 = arith.constant 0 : index
      %25 = vector.load %arg7[%c0_20, %c0_21] : memref<16x32xbf16, #tpu.memory_space<vmem>>, vector<16x32xbf16>
      tpu.vector_store %arg7[%c0_20, %c0_21], %24 {strides = array<i32>} : memref<16x32xbf16, #tpu.memory_space<vmem>>, vector<16x32xbf16>,
    } else {
    }
    return
  }
  func.func @transform_0(%arg0: i32, %arg1: i32) -> (i32, i32) {
    %c0_i32 = arith.constant 0 : i32
    %c0_i32_0 = arith.constant 0 : i32
    return %arg0, %c0_i32 : i32, i32
  }
  func.func @transform_1(%arg0: i32, %arg1: i32) -> (i32, i32) {
    %c0_i32 = arith.constant 0 : i32
    %c0_i32_0 = arith.constant 0 : i32
    return %c0_i32, %arg1 : i32, i32
  }
  func.func @transform_2(%arg0: i32, %arg1: i32) -> (i32, i32) {
    %c0_i32 = arith.constant 0 : i32
    %c0_i32_0 = arith.constant 0 : i32
    return %c0_i32, %arg1 : i32, i32
  }
  func.func @transform_3(%arg0: i32, %arg1: i32) -> (i32, i32) {
    %c0_i32 = arith.constant 0 : i32
    %c0_i32_0 = arith.constant 0 : i32
    return %arg1, %c0_i32 : i32, i32
  }
  func.func @transform_4(%arg0: i32, %arg1: i32) -> (i32, i32) {
    %c0_i32 = arith.constant 0 : i32
    %c0_i32_0 = arith.constant 0 : i32
    %c0_i32_1 = arith.constant 0 : i32
    return %c0_i32, %c0_i32_0 : i32, i32
  }
  func.func @transform_5(%arg0: i32, %arg1: i32) -> (i32, i32) {
    %c0_i32 = arith.constant 0 : i32
    %c0_i32_0 = arith.constant 0 : i32
    return %arg0, %c0_i32 : i32, i32
  }
}

</mosaic_0001>

<bundles_post_ra>
// kernel: encoder_decoder.39
= control target key start
LH: loop header
LB: loop body
LE: loop exit
PB: predicated region body
PF: predicated region fallthrough
CT: control target
= control target key end

     0   :  { %vm19_vm0 = vcmask 785408   ;;  %v151_v0 = vmov 0.0   ;;  %vm152_vm1 = vmmov 0   ;;  %vm47_vm2 = vcmask 261120   ;;  %s195_s1 = inlined_call_operand.vmem [shape: bf16[32,96], index: 1, kind: input, shape index: {}]   ;;  %s196_s0 = inlined_call_operand.vmem [shape: bf16[16,32], index: 0, kind: input, shape index: {}]   ;;  %s197_s2 = inlined_call_operand.vmem [shape: f32[1,96], index: 2, kind: input, shape index: {}]   ;;  %s198_s3 = inlined_call_operand.vmem [shape: bf16[16,96], index: 3, kind: output, shape index: {}]  }
   0x1   :  { %138 = vmatprep.subr.bf16.mxu0 %v151_v0  ;;  %v148_v1 = vld [vmem:[%s195_s1] sm:$0xff]   ;;  %142 = vmatprep.mubr.msk.bf16.mxu0 %vm152_vm1, %v151_v0  ;;  %20 = vst.msk [vmem:[#allocation2] sm:$0xff] %vm19_vm0, %v151_v0  ;;  %21 = vst.msk [vmem:[#allocation2 + $0x8] sm:$0xff] %vm19_vm0, %v151_v0  ;;  %v149_v2 = vld [vmem:[%s195_s1 + $0x8] sm:$0xff]   ;;  %vm119_vm3 = vcmask 781312  }
   0x2   :  { %139 = vmatpush3.bf16.msra.mxu0 %v148_v1  ;;  %v150_v3 = vld [vmem:[%s196_s0] sm:$0xff]  }
   0x3   :  { %140 = vmatprep.subr.bf16.mxu0 %v151_v0  ;;  %v130_v12 = vld [vmem:[%s197_s2] ss:$0 sm:$0xff] }
   0x6   :  { %141 = vmatpush3.bf16.msra.mxu0 %v149_v2 }
   0x8   :  { %v22_v4 = vld [vmem:[#allocation2] sm:$0xff]  ;;  %v23_v6 = vld [vmem:[#allocation2 + $0x8] sm:$0xff] }
   0x9   :  { %143 = vmatmul.mubr.msk.bf16.vlgmr.msra.gmra.mrb[0].mxu0 %vm47_vm2, %v150_v3 }
  0xdc   :  { %v85_v5 = vpop.f32.mrb[0].mxu0 }
  0xdd   :  { %v92_v7 = vadd.f32 %v85_v5, %v22_v4  ;;  %v144_v8 = vpop.f32.mrb[1].mxu0 }
  0xde   :  { %v88_v9 = vpop.f32.mrb[2].mxu0 }
  0xdf   :  { %95 = vst.msk [vmem:[#allocation2] sm:$0xff] %vm19_vm0, %v92_v7  ;;  %v93_v10 = vadd.f32 %v88_v9, %v23_v6  ;;  %v145_v11 = vpop.f32.mrb[3].mxu0 }
  0xe1   :  { %96 = vst.msk [vmem:[#allocation2 + $0x8] sm:$0xff] %vm19_vm0, %v93_v10 }
  0xe6   :  { %v100_v13 = vld [vmem:[#allocation2] sm:$0xff] }
  0xe7   :  { %v109_v14 = vadd.f32 %v130_v12, %v100_v13 }
  0xe8   :  { %v101_v15 = vld [vmem:[#allocation2 + $0x8] sm:$0xff] }
  0xe9   :  { %v133_v16 = vpack.c.bf16 %v109_v14, %v109_v14  ;;  %v110_v17 = vadd.f32 %v130_v12, %v101_v15 }
  0xeb   :  { %120 = vst.msk [vmem:[%s198_s3] sm:$0xf] %vm119_vm3, %v133_v16  ;;  %v134_v18 = vpack.c.bf16 %v110_v17, %v110_v17 }
  0xed   :  { %121 = vst.msk [vmem:[%s198_s3 + $0x4] sm:$0xf] %vm119_vm3, %v134_v18 }

// kernel: encoder_decoder.38
= control target key start
LH: loop header
LB: loop body
LE: loop exit
PB: predicated region body
PF: predicated region fallthrough
CT: control target
= control target key end

     0   :  { %vm18_vm0 = vcmask 261120   ;;  %vm72_vm1 = vcmask 257024   ;;  %s132_s0 = inlined_call_operand.vmem [shape: bf16[16,32], index: 0, kind: input, shape index: {}]   ;;  %s133_s1 = inlined_call_operand.vmem [shape: f32[1,32], index: 1, kind: input, shape index: {}]   ;;  %s134_s2 = inlined_call_operand.vmem [shape: f32[1,32], index: 2, kind: input, shape index: {}]   ;;  %s135_s3 = inlined_call_operand.vmem [shape: bf16[16,32], index: 3, kind: output, shape index: {}]  }
   0x1   :  { %v86_v0 = vld [vmem:[%s132_s0] sm:$0xff]  }
   0x2   :  { %v87_v1 = vunpack.c.l.bf16 %v86_v0  ;;  %v88_v2 = vunpack.c.h.bf16 %v86_v0  ;;  %v79_v22 = vld [vmem:[%s133_s1] ss:$0 sm:$0xff] }
   0x3   :  { %v80_v24 = vld [vmem:[%s134_s2] ss:$0 sm:$0xff] }
   0x4   :  { %v19_v3 = vsel %vm18_vm0, %v87_v1, 0.0  ;;  %v22_v4 = vsel %vm18_vm0, %v88_v2, 0.0 }
   0x5   :  { %20 = vadd.xlane.f32.xlu0 %v19_v3 }
   0x9   :  { %23 = vadd.xlane.f32.xlu0 %v22_v4 }
  0x92   :  { %v21_v5 = vpop.xlane.xlu0 %20 }
  0x93   :  { %v26_v6 = vmul.f32 0.03125, %v21_v5 }
  0x95   :  { %v28_v7 = vsub.f32 %v87_v1, %v26_v6 }
  0x96   :  { %v24_v8 = vpop.xlane.xlu0 %23 }
  0x97   :  { %v27_v9 = vmul.f32 0.03125, %v24_v8  ;;  %v30_v10 = vmul.f32 %v28_v7, %v28_v7 }
  0x99   :  { %v29_v11 = vsub.f32 %v88_v2, %v27_v9  ;;  %v32_v12 = vsel %vm18_vm0, %v30_v10, 0.0 }
  0x9a   :  { %33 = vadd.xlane.f32.xlu1 %v32_v12 }
  0x9b   :  { %v31_v13 = vmul.f32 %v29_v11, %v29_v11 }
  0x9d   :  { %v35_v14 = vsel %vm18_vm0, %v31_v13, 0.0 }
  0x9e   :  { %36 = vadd.xlane.f32.xlu1 %v35_v14 }
 0x127   :  { %v34_v15 = vpop.xlane.xlu1 %33 }
 0x128   :  { %v38_v16 = vmul.f32 0.03125, %v34_v15 }
 0x12a   :  { %v40_v17 = vadd.f32 1e-05, %v38_v16 }
 0x12b   :  { %v37_v18 = vpop.xlane.xlu1 %36 }
 0x12c   :  { %89 = vrsqrt.f32 %v40_v17  ;;  %v39_v19 = vmul.f32 0.03125, %v37_v18 }
 0x12e   :  { %v41_v20 = vadd.f32 1e-05, %v39_v19 }
 0x130   :  { %91 = vrsqrt.f32 %v41_v20 }
 0x136   :  { %v90_v21 = vpop.eup %89 }
 0x137   :  { %v44_v23 = vmul.f32 %v90_v21, %v28_v7 }
 0x139   :  { %v53_v25 = vmul.f32 %v79_v22, %v44_v23 }
 0x13a   :  { %v92_v26 = vpop.eup %91 }
 0x13b   :  { %v62_v27 = vadd.f32 %v80_v24, %v53_v25  ;;  %v45_v28 = vmul.f32 %v92_v26, %v29_v11 }
 0x13d   :  { %v83_v29 = vpack.c.bf16 %v62_v27, %v62_v27  ;;  %v54_v30 = vmul.f32 %v79_v22, %v45_v28 }
 0x13f   :  { %73 = vst.msk [vmem:[%s135_s3] sm:$0xf] %vm72_vm1, %v83_v29  ;;  %v63_v31 = vadd.f32 %v80_v24, %v54_v30 }
 0x141   :  { %v84_v32 = vpack.c.bf16 %v63_v31, %v63_v31 }
 0x143   :  { %74 = vst.msk [vmem:[%s135_s3 + $0x4] sm:$0xf] %vm72_vm1, %v84_v32 }

// kernel: encoder_decoder.37
= control target key start
LH: loop header
LB: loop body
LE: loop exit
PB: predicated region body
PF: predicated region fallthrough
CT: control target
= control target key end

     0   :  { %s809_s12 = smov 0   ;;  %s811_s13 = smov 0   ;;  %s910_s0 = inlined_call_operand.vmem [shape: bf16[16,768], index: 0, kind: input, shape index: {}]   ;;  %s911_s1 = inlined_call_operand.vmem [shape: bf16[768,32], index: 1, kind: input, shape index: {}]   ;;  %s912_s2 = inlined_call_operand.vmem [shape: f32[1,32], index: 2, kind: input, shape index: {}]   ;;  %s913_s3 = inlined_call_operand.vmem [shape: bf16[16,32], index: 3, kind: output, shape index: {}]  }
   0x1   :  { %s813_s14 = smov 0   ;;  %s815_s15 = smov 0  }
   0x2   :  { %s817_s16 = smov 0  }
   0x3 LB: > { %s25_s17 = sadd.s32 1, %s782_s15  ;;  %p48_p1 = scmp.ne.s32.totalorder %s774_s13, %s770_s12  ;;  %s786_s16 = sphi %s817_s16, %s13_s16   ;;  %s782_s15 = sphi %s815_s15, %s917_s15   ;;  %s778_s14 = sphi %s813_s14, %s916_s14   ;;  %s774_s13 = sphi %s811_s13, %s915_s13   ;;  %s770_s12 = sphi %s809_s12, %s914_s12  }
   0x4   : > { %p26_p0 = scmp.ge.s32.totalorder %s25_s17, 3  ;;  %p49_p2 = scmp.eq.s32.totalorder %s786_s16, 0 }
   0x5   : > { %s41_s19 = sadd.s32 1, %s774_s13  ;;  %p628_p5 = scmp.ge.s32.totalorder %s786_s16, 3 }
   0x6   : > { %s919_s17 = smov (%p26_p0, %s25_s17), 0  ;;  %p50_p3 = por %p49_p2, %p48_p1 }
   0x7   : > { %s37_s18 = ssub.s32 %s782_s15, %s919_s17  ;;  %162 = sbr.rel (%p628_p5) target bundleno = 21 (0x15), region = 20 }
   0x8   : > { %p39_p4 = scmp.eq.s32.totalorder %s37_s18, 0 }
   0xa   : > { %s844_s20 = scalar_select %p39_p4, %s774_s13, %s41_s19  }
   0xe   : > { %165 = sbr.rel (!%p50_p3) target bundleno = 21 (0x15), region = 24  ;;  %s167_s21 = sand.u32 (%p50_p3), 1, %s774_s13  }
   0xf   : > { %s663_s22 = sshll.u32 (%p50_p3), %s782_s15, 3  ;;  %s629_s23 = sshll.u32 (%p50_p3), %s167_s21, 4 }
  0x10   : > { %s175_s26 = scalar_lea.vmem (%p50_p3), %s910_s0, %s663_s22  ;;  %s169_s27 = scalar_lea.vmem (%p50_p3), [#allocation3], %s629_s23 }
  0x11   : > { %v205_v0 = vld [vmem:[%s175_s26] sm:$0xff] (%p50_p3)  ;;  %v207_v1 = vld [vmem:[%s175_s26 + $0x18] sm:$0xff] (%p50_p3) }
  0x12   : > { %206 = vst [vmem:[%s169_s27] sm:$0xff] (%p50_p3), %v205_v0  ;;  %208 = vst [vmem:[%s169_s27 + $0x8] sm:$0xff] (%p50_p3), %v207_v1 }
  0x15 PF: > { %p632_p6 = scmp.ge.s32.totalorder %s786_s16, 1  ;;  %p225_p7 = scmp.lt.s32.totalorder %s786_s16, 4 }
  0x17   : > { %p226_p8 = pnand %p632_p6, %p225_p7 }
  0x18   : > { %s232_s28 = sand.u32 (!%p226_p8), 1, %s770_s12   ;;  %s634_s29 = sshll.u32 (!%p226_p8), %s778_s14, 5 }
  0x19   : > { %229 = sbr.rel (%p226_p8) target bundleno = 304 (0x130), region = 66  ;;  %s856_s30 = sshll.u32 (!%p226_p8), %s232_s28, 4 }
  0x1a   : > { %p272_p9 = scmp.lt.s32.totalorder (!%p226_p8), %s634_s29, 95  ;;  %s234_s8 = scalar_lea.vmem (!%p226_p8), [#allocation3], %s856_s30 }
  0x1b   : > { %p636_p10 = scmp.ne.s32.totalorder (!%p226_p8), %s778_s14, 0 }
  0x20   : > { %s921_s29 = smov (!%p272_p9, %s634_s29), 95  ;;  %296 = sbr.rel (%p636_p10) target bundleno = 39 (0x27), region = 74 }
  0x21   : > { %s635_s4 = sshll.u32 %s921_s29, 2  ;;  %vm297_vm0 = vcmask (!%p636_p10), 261120   ;;  %v788_v2 = vmov (!%p636_p10), 0.0  }
  0x22   : > { %s861_s7 = scalar_lea.vmem %s911_s1, %s635_s4  ;;  %298 = vst.msk [vmem:[#allocation2] sm:$0xff] (!%p636_p10), %vm297_vm0, %v788_v2  ;;  %299 = vst.msk [vmem:[#allocation2 + $0x8] sm:$0xff] (!%p636_p10), %vm297_vm0, %v788_v2 }
  0x27 PF: > { %v729_v3 = vld [vmem:[%s861_s7 + $0x40] sm:$0xff]   ;;  %v731_v5 = vld [vmem:[%s861_s7 + $0x48] sm:$0xff]   ;;  %v733_v7 = vld [vmem:[%s861_s7 + $0x50] sm:$0xff]   ;;  %vm485_vm1 = vcmask 261120   ;;  %p655_p11 = scmp.ne.s32.totalorder %s778_s14, 2 }
  0x28   : > { %v730_v4 = vld [vmem:[%s861_s7] sm:$0xff]   ;;  %666 = vmatprep.subr.bf16.mxu0 %v729_v3  ;;  %v732_v6 = vld [vmem:[%s861_s7 + $0x8] sm:$0xff]   ;;  %v734_v8 = vld [vmem:[%s861_s7 + $0x10] sm:$0xff]   ;;  %vm511_vm2 = vcmask (!%p655_p11), 257024  }
  0x29   : > { %667 = vmatpush3.bf16.msra.mxu0 %v730_v4  ;;  %v735_v9 = vld [vmem:[%s861_s7 + $0x58] sm:$0xff]   ;;  %v737_v11 = vld [vmem:[%s861_s7 + $0x60] sm:$0xff]   ;;  %v739_v13 = vld [vmem:[%s861_s7 + $0x68] sm:$0xff]  }
  0x2a   : > { %668 = vmatprep.subr.bf16.mxu0 %v731_v5  ;;  %v736_v10 = vld [vmem:[%s861_s7 + $0x18] sm:$0xff]   ;;  %v738_v12 = vld [vmem:[%s861_s7 + $0x20] sm:$0xff]   ;;  %v740_v15 = vld [vmem:[%s861_s7 + $0x28] sm:$0xff]  }
  0x2b   : > { %v747_v14 = vld [vmem:[%s234_s8 + $0x4] ss:$8 sps:$4 sm:$0xff]   ;;  %v745_v20 = vld [vmem:[%s234_s8] ss:$8 sps:$4 sm:$0xff]  }
  0x2c   : > { %474 = vmatprep.mubr.bf16.mxu0 %v747_v14  ;;  %v741_v16 = vld [vmem:[%s861_s7 + $0x70] sm:$0xff]   ;;  %v743_v18 = vld [vmem:[%s861_s7 + $0x78] sm:$0xff]   ;;  %v300_v22 = vld [vmem:[#allocation2] sm:$0xff] }
  0x2d   : > { %669 = vmatpush3.bf16.msra.mxu0 %v732_v6  ;;  %v742_v17 = vld [vmem:[%s861_s7 + $0x30] sm:$0xff]   ;;  %v744_v19 = vld [vmem:[%s861_s7 + $0x38] sm:$0xff]   ;;  %v301_v26 = vld [vmem:[#allocation2 + $0x8] sm:$0xff] }
  0x2e   : > { %670 = vmatprep.subr.bf16.mxu0 %v733_v7  ;;  %v656_v32 = vld [vmem:[%s912_s2] ss:$0 sm:$0xff] (!%p655_p11) }
  0x31   : > { %671 = vmatpush3.bf16.msra.mxu0 %v734_v8 }
  0x32   : > { %672 = vmatprep.subr.bf16.mxu0 %v735_v9 }
  0x35   : > { %673 = vmatpush3.bf16.msra.mxu0 %v736_v10 }
  0x36   : > { %674 = vmatprep.subr.bf16.mxu0 %v737_v11 }
  0x39   : > { %675 = vmatpush3.bf16.msra.mxu0 %v738_v12 }
  0x3a   : > { %676 = vmatprep.subr.bf16.mxu0 %v739_v13 }
  0x3d   : > { %677 = vmatpush3.bf16.msra.mxu0 %v740_v15 }
  0x3e   : > { %678 = vmatprep.subr.bf16.mxu0 %v741_v16 }
  0x41   : > { %679 = vmatpush3.bf16.msra.mxu0 %v742_v17 }
  0x42   : > { %680 = vmatprep.subr.bf16.mxu0 %v743_v18 }
  0x45   : > { %681 = vmatpush3.bf16.msra.mxu0 %v744_v19 }
  0x48   : > { %475 = vmatmul.mubr.bf16.vlgmr.msra.gmra.mrb[0].mxu0 %v745_v20 }
 0x11b   : > { %v682_v21 = vpop.f32.mrb[0].mxu0 }
 0x11c   : > { %v683_v23 = vpop.f32.mrb[1].mxu0 }
 0x11d   : > { %v684_v24 = vadd.f32 %v683_v23, %v682_v21  ;;  %v685_v25 = vpop.f32.mrb[2].mxu0  ;;  %491 = sbr.rel (%p655_p11) target bundleno = 304 (0x130), region = 78 }
 0x11e   : > { %v686_v27 = vpop.f32.mrb[3].mxu0 }
 0x11f   : > { %v483_v28 = vadd.f32 %v684_v24, %v300_v22  ;;  %v687_v29 = vadd.f32 %v686_v27, %v685_v25 }
 0x121   : > { %486 = vst.msk [vmem:[#allocation2] sm:$0xff] %vm485_vm1, %v483_v28  ;;  %v484_v30 = vadd.f32 %v687_v29, %v301_v26 }
 0x123   : > { %487 = vst.msk [vmem:[#allocation2 + $0x8] sm:$0xff] %vm485_vm1, %v484_v30 }
 0x128   : > { %v492_v31 = vld [vmem:[#allocation2] sm:$0xff] }
 0x129   : > { %v501_v34 = vadd.f32 %v656_v32, %v492_v31 }
 0x12a   : > { %v493_v33 = vld [vmem:[#allocation2 + $0x8] sm:$0xff] }
 0x12b   : > { %v502_v35 = vadd.f32 %v656_v32, %v493_v33  ;;  %v664_v36 = vpack.c.bf16 %v501_v34, %v501_v34 }
 0x12d   : > { %v665_v37 = vpack.c.bf16 %v502_v35, %v502_v35  ;;  %512 = vst.msk [vmem:[%s913_s3] sm:$0xf] %vm511_vm2, %v664_v36 }
 0x12f   : > { %513 = vst.msk [vmem:[%s913_s3 + $0x4] sm:$0xf] %vm511_vm2, %v665_v37 }
 0x130 PF: > { %s13_s16 = sadd.s32 1, %s786_s16   ;;  %s914_s12 = smov %s774_s13 }
 0x131   : > { %p10_p12 = scmp.ge.s32.totalorder %s13_s16, 5   ;;  %s915_s13 = smov %s844_s20 }
 0x132   : > { %s916_s14 = smov %s782_s15  ;;  %s917_s15 = smov %s919_s17 }
 0x133   :  { %12 = sbr.rel (!%p10_p12) target bundleno = 3 (0x3), region = 119 }

// kernel: encoder_decoder.40
= control target key start
LH: loop header
LB: loop body
LE: loop exit
PB: predicated region body
PF: predicated region fallthrough
CT: control target
= control target key end

     0   :  { %s652_s12 = smov 0   ;;  %s654_s13 = smov 0   ;;  %s715_s0 = inlined_call_operand.vmem [shape: bf16[2,4,5,8], index: 0, kind: input, shape index: {}]   ;;  %s716_s1 = inlined_call_operand.vmem [shape: bf16[2,4,5,8], index: 1, kind: input, shape index: {}]   ;;  %s717_s2 = inlined_call_operand.vmem [shape: bf16[2,4,5,8], index: 2, kind: input, shape index: {}]   ;;  %s718_s3 = inlined_call_operand.vmem [shape: bf16[2,4,5,8], index: 3, kind: output, shape index: {}]  }
   0x1   :  { %s656_s14 = smov 0   ;;  %s658_s15 = smov 0  }
   0x2   :  { %s660_s16 = smov 0  }
   0x3 LB: > { %s22_s17 = sadd.s32 1, %s619_s14  ;;  %s25_s18 = sadd.s32 1, %s623_s15  ;;  %s627_s16 = sphi %s660_s16, %s13_s16   ;;  %s623_s15 = sphi %s658_s15, %s722_s15   ;;  %s619_s14 = sphi %s656_s14, %s721_s14   ;;  %s615_s13 = sphi %s654_s13, %s720_s13   ;;  %s611_s12 = sphi %s652_s12, %s719_s12  }
   0x4   : > { %p23_p0 = scmp.ge.s32.totalorder %s22_s17, 4  ;;  %p513_p1 = scmp.ge.s32.totalorder %s627_s16, 1 }
   0x5   : > { %p186_p2 = scmp.lt.s32.totalorder %s627_s16, 9 }
   0x6   : > { %s724_s17 = smov (%p23_p0, %s22_s17), 0  ;;  %s726_s18 = smov (!%p23_p0, %s25_s18), %s623_s15 }
   0x7   : > { %p187_p3 = pnand %p513_p1, %p186_p2  ;;  %p27_p4 = scmp.ge.s32.totalorder %s726_s18, 2 }
   0x8   : > { %p232_p5 = scmp.lt.s32.totalorder (!%p187_p3), %s615_s13, 1  ;;  %p234_p6 = scmp.lt.s32.totalorder (!%p187_p3), %s611_s12, 3  ;;  %v629_v0 = vmov (!%p187_p3), 0.0   ;;  %vm630_vm0 = vmmov (!%p187_p3), 0   ;;  %vm268_vm1 = vcmask (!%p187_p3), 64512   ;;  %vm316_vm2 = vcmask (!%p187_p3), 36864  }
   0x9   : > { %s728_s18 = smov (%p27_p4, %s726_s18), 0  ;;  %190 = sbr.rel (%p187_p3) target bundleno = 776 (0x308), region = 32 }
   0xa   : > { %530 = vmatprep.subr.bf16.mxu0 (!%p187_p3), %v629_v0  ;;  %532 = vmatprep.mubr.msk.bf16.mxu0 (!%p187_p3), %vm630_vm0, %v629_v0  ;;  %vm333_vm3 = vcmask (!%p187_p3), 1041408   ;;  %vm334_vm4 = vcmask (!%p187_p3), 1042432   ;;  %v631_v16 = vmov (!%p187_p3), 65535   ;;  %vm329_vm5 = vcmask (!%p187_p3), 39936  }
   0xb   : > { %536 = vmatprep.subr.bf16.mxu1 (!%p187_p3), %v629_v0  ;;  %538 = vmatprep.mubr.msk.bf16.mxu1 (!%p187_p3), %vm630_vm0, %v629_v0  ;;  %v335_v17 = vsel (!%p187_p3), %vm333_vm3, 4294967295, %v631_v16  ;;  %vm381_vm6 = vcmask (!%p187_p3), 59392   ;;  %vm382_vm7 = vsmask.f32 (!%p187_p3), 2304 }
   0xc   : > { %v336_v18 = vsel (!%p187_p3), %vm334_vm4, %v335_v17, 0  ;;  %vm383_vm8 = vmand (!%p187_p3), %vm381_vm6, %vm382_vm7 }
  0x10   : > { %s730_s13 = smov (!%p232_p5, %s615_s13), 1  ;;  %s732_s12 = smov (!%p234_p6, %s611_s12), 3 }
  0x11   : > { %s514_s19 = sshll.u32 %s730_s13, 2 }
  0x12   : > { %s237_s20 = sadd.s32 %s514_s19, %s732_s12 }
  0x13   : > { %s682_s21 = sshll.u32 %s237_s20, 2 }
  0x14   : > { %s247_s24 = scalar_lea.vmem %s716_s1, %s682_s21  ;;  %s239_s27 = scalar_lea.vmem %s715_s0, %s682_s21 }
  0x15   : > { %v266_v1 = vld [vmem:[%s247_s24] sm:$0x7]  ;;  %s255_s30 = scalar_lea.vmem %s717_s2, %s682_s21  ;;  %s263_s6 = scalar_lea.vmem %s718_s3, %s682_s21 }
  0x16   : > { %v273_v2 = vsel %vm268_vm1, %v266_v1, 0  ;;  %v265_v3 = vld [vmem:[%s239_s27] sm:$0x7] }
  0x17   : > { %531 = vmatpush3.bf16.xpose.msra.mxu0 %v273_v2  ;;  %v267_v15 = vld [vmem:[%s255_s30] sm:$0x7] }
  0x18   : > { %v338_v19 = vand.u32 %v336_v18, %v267_v15  ;;  %v384_v25 = vld [vmem:[%s263_s6] sm:$0x7] }
  0x1a   : > { %537 = vmatpush3.bf16.msra.mxu1 %v338_v19 }
  0x1e   : > { %533 = vmatmul.mubr.msk.bf16.vlgmr.msra.gmra.mrb[0].mxu0 %vm268_vm1, %v265_v3 }
  0xf1   : > { %v309_v4 = vpop.f32.mrb[0].mxu0 }
  0xf2   : > { %v315_v5 = vmul.f32 0.35355338, %v309_v4  ;;  %v534_v6 = vpop.f32.mrb[1].mxu0 }
  0xf3   : > { %v312_v7 = vpop.f32.mrb[2].mxu0 }
  0xf4   : > { %v535_v8 = vpop.f32.mrb[3].mxu0  ;;  %v317_v9 = vsel %vm316_vm2, %v315_v5, -inf }
  0xf5   : > { %318 = vmax.xlane.f32.xlu0 %v317_v9 }
 0x182   : > { %v319_v10 = vpop.xlane.xlu0 %318 }
 0x183   : > { %v320_v11 = vsub.f32 %v315_v5, %v319_v10 }
 0x185   : > { %v321_v12 = vmul.f32 1.442695, %v320_v11 }
 0x187   : > { %585 = vpow2.f32 %v321_v12 }
 0x191   : > { %v586_v13 = vpop.eup %585 }
 0x192   : > { %v323_v14 = vsel %vm316_vm2, %v586_v13, 0.0 }
 0x193   : > { %324 = vadd.xlane.f32.xlu0 %v323_v14 }
 0x220   : > { %v325_v20 = vpop.xlane.xlu0 %324 }
 0x221   : > { %587 = vrcp.f32 %v325_v20 }
 0x22b   : > { %v588_v21 = vpop.eup %587 }
 0x22c   : > { %v327_v22 = vmul.f32 %v588_v21, %v586_v13 }
 0x22e   : > { %v328_v23 = vpack.c.bf16 %v327_v22, %v327_v22 }
 0x230   : > { %539 = vmatmul.mubr.msk.bf16.vlgmr.msra.gmra.mrb[0].mxu1 %vm329_vm5, %v328_v23 }
 0x303   : > { %v374_v24 = vpop.f32.mrb[0].mxu1 }
 0x304   : > { %v380_v26 = vpack.c.bf16 %v374_v24, %v374_v24  ;;  %v540_v27 = vpop.f32.mrb[1].mxu1 }
 0x305   : > { %v377_v28 = vpop.f32.mrb[2].mxu1 }
 0x306   : > { %v385_v29 = vsel %vm383_vm8, %v380_v26, %v384_v25  ;;  %v541_v30 = vpop.f32.mrb[3].mxu1 }
 0x307   : > { %386 = vst [vmem:[%s263_s6] sm:$0x7] %v385_v29 }
 0x308 PF: > { %s13_s16 = sadd.s32 1, %s627_s16   ;;  %s719_s12 = smov %s619_s14 }
 0x309   : > { %p10_p7 = scmp.ge.s32.totalorder %s13_s16, 10   ;;  %s720_s13 = smov %s623_s15 }
 0x30a   : > { %s721_s14 = smov %s724_s17  ;;  %s722_s15 = smov %s728_s18 }
 0x30b   :  { %12 = sbr.rel (!%p10_p7) target bundleno = 3 (0x3), region = 68 }

// kernel: encoder_decoder.41
= control target key start
LH: loop header
LB: loop body
LE: loop exit
PB: predicated region body
PF: predicated region fallthrough
CT: control target
= control target key end

     0   :  { %vm22_vm0 = vcmask 261120   ;;  %v163_v0 = vmov 0.0   ;;  %vm164_vm1 = vmmov 0   ;;  %vm127_vm2 = vcmask 257024   ;;  %s216_s1 = inlined_call_operand.vmem [shape: bf16[32,32], index: 1, kind: input, shape index: {}]   ;;  %s217_s0 = inlined_call_operand.vmem [shape: bf16[16,32], index: 0, kind: input, shape index: {}]   ;;  %s218_s3 = inlined_call_operand.vmem [shape: bf16[16,32], index: 3, kind: input, shape index: {}]   ;;  %s219_s2 = inlined_call_operand.vmem [shape: f32[1,32], index: 2, kind: input, shape index: {}]   ;;  %s220_s4 = inlined_call_operand.vmem [shape: bf16[16,32], index: 4, kind: output, shape index: {}]  }
   0x1   :  { %150 = vmatprep.subr.bf16.mxu0 %v163_v0  ;;  %v160_v1 = vld [vmem:[%s216_s1] sm:$0xff]   ;;  %154 = vmatprep.mubr.msk.bf16.mxu0 %vm164_vm1, %v163_v0  ;;  %23 = vst.msk [vmem:[#allocation2] sm:$0xff] %vm22_vm0, %v163_v0  ;;  %24 = vst.msk [vmem:[#allocation2 + $0x8] sm:$0xff] %vm22_vm0, %v163_v0  ;;  %v161_v2 = vld [vmem:[%s216_s1 + $0x8] sm:$0xff]  }
   0x2   :  { %151 = vmatpush3.bf16.msra.mxu0 %v160_v1  ;;  %v162_v3 = vld [vmem:[%s217_s0] sm:$0xff]  }
   0x3   :  { %152 = vmatprep.subr.bf16.mxu0 %v163_v0  ;;  %v144_v12 = vld [vmem:[%s218_s3] sm:$0xff]  }
   0x4   :  { %v138_v13 = vld [vmem:[%s219_s2] ss:$0 sm:$0xff]  ;;  %v145_v14 = vunpack.c.l.bf16 %v144_v12  ;;  %v146_v17 = vunpack.c.h.bf16 %v144_v12 }
   0x6   :  { %153 = vmatpush3.bf16.msra.mxu0 %v161_v2 }
   0x8   :  { %v25_v4 = vld [vmem:[#allocation2] sm:$0xff]  ;;  %v26_v6 = vld [vmem:[#allocation2 + $0x8] sm:$0xff] }
   0x9   :  { %155 = vmatmul.mubr.msk.bf16.vlgmr.msra.gmra.mrb[0].mxu0 %vm22_vm0, %v162_v3 }
  0xdc   :  { %v88_v5 = vpop.f32.mrb[0].mxu0 }
  0xdd   :  { %v95_v7 = vadd.f32 %v88_v5, %v25_v4  ;;  %v156_v8 = vpop.f32.mrb[1].mxu0 }
  0xde   :  { %v91_v9 = vpop.f32.mrb[2].mxu0 }
  0xdf   :  { %97 = vst.msk [vmem:[#allocation2] sm:$0xff] %vm22_vm0, %v95_v7  ;;  %v96_v10 = vadd.f32 %v91_v9, %v26_v6  ;;  %v157_v11 = vpop.f32.mrb[3].mxu0 }
  0xe1   :  { %98 = vst.msk [vmem:[#allocation2 + $0x8] sm:$0xff] %vm22_vm0, %v96_v10 }
  0xe6   :  { %v102_v15 = vld [vmem:[#allocation2] sm:$0xff] }
  0xe7   :  { %v111_v16 = vadd.f32 %v138_v13, %v102_v15 }
  0xe8   :  { %v103_v18 = vld [vmem:[#allocation2 + $0x8] sm:$0xff] }
  0xe9   :  { %v117_v19 = vadd.f32 %v145_v14, %v111_v16  ;;  %v112_v20 = vadd.f32 %v138_v13, %v103_v18 }
  0xeb   :  { %v141_v21 = vpack.c.bf16 %v117_v19, %v117_v19  ;;  %v118_v22 = vadd.f32 %v146_v17, %v112_v20 }
  0xed   :  { %128 = vst.msk [vmem:[%s220_s4] sm:$0xf] %vm127_vm2, %v141_v21  ;;  %v142_v23 = vpack.c.bf16 %v118_v22, %v118_v22 }
  0xef   :  { %129 = vst.msk [vmem:[%s220_s4 + $0x4] sm:$0xf] %vm127_vm2, %v142_v23 }

// kernel: encoder_decoder.56
= control target key start
LH: loop header
LB: loop body
LE: loop exit
PB: predicated region body
PF: predicated region fallthrough
CT: control target
= control target key end

     0   :  { %vm19_vm0 = vcmask 523264   ;;  %v151_v0 = vmov 0.0   ;;  %vm152_vm1 = vmmov 0   ;;  %vm47_vm2 = vcmask 261120   ;;  %s195_s1 = inlined_call_operand.vmem [shape: bf16[32,64], index: 1, kind: input, shape index: {}]   ;;  %s196_s0 = inlined_call_operand.vmem [shape: bf16[16,32], index: 0, kind: input, shape index: {}]   ;;  %s197_s2 = inlined_call_operand.vmem [shape: f32[1,64], index: 2, kind: input, shape index: {}]   ;;  %s198_s3 = inlined_call_operand.vmem [shape: bf16[16,64], index: 3, kind: output, shape index: {}]  }
   0x1   :  { %138 = vmatprep.subr.bf16.mxu0 %v151_v0  ;;  %v148_v1 = vld [vmem:[%s195_s1] sm:$0xff]   ;;  %142 = vmatprep.mubr.msk.bf16.mxu0 %vm152_vm1, %v151_v0  ;;  %20 = vst.msk [vmem:[#allocation2] sm:$0xff] %vm19_vm0, %v151_v0  ;;  %21 = vst.msk [vmem:[#allocation2 + $0x8] sm:$0xff] %vm19_vm0, %v151_v0  ;;  %v149_v2 = vld [vmem:[%s195_s1 + $0x8] sm:$0xff]   ;;  %vm119_vm3 = vcmask 519168  }
   0x2   :  { %139 = vmatpush3.bf16.msra.mxu0 %v148_v1  ;;  %v150_v3 = vld [vmem:[%s196_s0] sm:$0xff]  }
   0x3   :  { %140 = vmatprep.subr.bf16.mxu0 %v151_v0  ;;  %v130_v12 = vld [vmem:[%s197_s2] ss:$0 sm:$0xff] }
   0x6   :  { %141 = vmatpush3.bf16.msra.mxu0 %v149_v2 }
   0x8   :  { %v22_v4 = vld [vmem:[#allocation2] sm:$0xff]  ;;  %v23_v6 = vld [vmem:[#allocation2 + $0x8] sm:$0xff] }
   0x9   :  { %143 = vmatmul.mubr.msk.bf16.vlgmr.msra.gmra.mrb[0].mxu0 %vm47_vm2, %v150_v3 }
  0xdc   :  { %v85_v5 = vpop.f32.mrb[0].mxu0 }
  0xdd   :  { %v92_v7 = vadd.f32 %v85_v5, %v22_v4  ;;  %v144_v8 = vpop.f32.mrb[1].mxu0 }
  0xde   :  { %v88_v9 = vpop.f32.mrb[2].mxu0 }
  0xdf   :  { %95 = vst.msk [vmem:[#allocation2] sm:$0xff] %vm19_vm0, %v92_v7  ;;  %v93_v10 = vadd.f32 %v88_v9, %v23_v6  ;;  %v145_v11 = vpop.f32.mrb[3].mxu0 }
  0xe1   :  { %96 = vst.msk [vmem:[#allocation2 + $0x8] sm:$0xff] %vm19_vm0, %v93_v10 }
  0xe6   :  { %v100_v13 = vld [vmem:[#allocation2] sm:$0xff] }
  0xe7   :  { %v109_v14 = vadd.f32 %v130_v12, %v100_v13 }
  0xe8   :  { %v101_v15 = vld [vmem:[#allocation2 + $0x8] sm:$0xff] }
  0xe9   :  { %v133_v16 = vpack.c.bf16 %v109_v14, %v109_v14  ;;  %v110_v17 = vadd.f32 %v130_v12, %v101_v15 }
  0xeb   :  { %120 = vst.msk [vmem:[%s198_s3] sm:$0xf] %vm119_vm3, %v133_v16  ;;  %v134_v18 = vpack.c.bf16 %v110_v17, %v110_v17 }
  0xed   :  { %121 = vst.msk [vmem:[%s198_s3 + $0x4] sm:$0xf] %vm119_vm3, %v134_v18 }

// kernel: encoder_decoder.43
= control target key start
LH: loop header
LB: loop body
LE: loop exit
PB: predicated region body
PF: predicated region fallthrough
CT: control target
= control target key end

     0   :  { %vm28_vm0 = vcmask 261120   ;;  %v303_v0 = vmov 0.0   ;;  %vm304_vm1 = vmmov 0   ;;  %vm159_vm2 = vcmask 523264   ;;  %s381_s1 = inlined_call_operand.vmem [shape: bf16[32,64], index: 1, kind: input, shape index: {}]   ;;  %s382_s0 = inlined_call_operand.vmem [shape: bf16[16,32], index: 0, kind: input, shape index: {}]   ;;  %s383_s3 = inlined_call_operand.vmem [shape: bf16[64,32], index: 3, kind: input, shape index: {}]   ;;  %s384_s2 = inlined_call_operand.vmem [shape: f32[1,64], index: 2, kind: input, shape index: {}]   ;;  %s385_s5 = inlined_call_operand.vmem [shape: bf16[16,32], index: 5, kind: input, shape index: {}]   ;;  %s386_s4 = inlined_call_operand.vmem [shape: f32[1,32], index: 4, kind: input, shape index: {}]   ;;  %s387_s6 = inlined_call_operand.vmem [shape: bf16[16,32], index: 6, kind: output, shape index: {}]  }
   0x1   :  { %270 = vmatprep.subr.bf16.mxu0 %v303_v0  ;;  %v292_v1 = vld [vmem:[%s381_s1] sm:$0xff]   ;;  %274 = vmatprep.mubr.msk.bf16.mxu0 %vm304_vm1, %v303_v0  ;;  %29 = vst.msk [vmem:[#allocation2] sm:$0xff] %vm28_vm0, %v303_v0  ;;  %30 = vst.msk [vmem:[#allocation2 + $0x8] sm:$0xff] %vm28_vm0, %v303_v0  ;;  %v293_v2 = vld [vmem:[%s381_s1 + $0x8] sm:$0xff]   ;;  %vm236_vm3 = vcmask 257024  }
   0x2   :  { %278 = vmatprep.subr.bf16.mxu1 %v303_v0  ;;  %286 = vmatprep.mubr.msk.bf16.mxu1 %vm304_vm1, %v303_v0  ;;  %v294_v3 = vld [vmem:[%s382_s0] sm:$0xff]   ;;  %v296_v5 = vld [vmem:[%s383_s3 + $0x8] sm:$0xff]   ;;  %v297_v6 = vld [vmem:[%s383_s3 + $0x10] sm:$0xff]  }
   0x3   :  { %271 = vmatpush3.bf16.msra.mxu0 %v292_v1  ;;  %v295_v4 = vld [vmem:[%s383_s3] sm:$0xff]   ;;  %v298_v7 = vld [vmem:[%s383_s3 + $0x18] sm:$0xff]  }
   0x4   :  { %272 = vmatprep.subr.bf16.mxu0 %v303_v0  ;;  %279 = vmatpush3.bf16.msra.mxu1 %v295_v4  ;;  %v243_v8 = vld [vmem:[%s384_s2] ss:$0 sm:$0xff] }
   0x5   :  { %280 = vmatprep.subr.bf16.mxu1 %v303_v0  ;;  %v259_v42 = vld [vmem:[%s385_s5] sm:$0xff]  }
   0x6   :  { %v253_v43 = vld [vmem:[%s386_s4] ss:$0 sm:$0xff]  ;;  %v260_v44 = vunpack.c.l.bf16 %v259_v42  ;;  %v261_v47 = vunpack.c.h.bf16 %v259_v42 }
   0x7   :  { %273 = vmatpush3.bf16.msra.mxu0 %v293_v2 }
   0x8   :  { %281 = vmatpush3.bf16.msra.mxu1 %v296_v5  ;;  %v124_v34 = vld [vmem:[#allocation2] sm:$0xff]  ;;  %v125_v36 = vld [vmem:[#allocation2 + $0x8] sm:$0xff] }
   0x9   :  { %282 = vmatprep.subr.bf16.mxu1 %v303_v0 }
   0xa   :  { %275 = vmatmul.mubr.msk.bf16.vlgmr.msra.gmra.mrb[0].mxu0 %vm28_vm0, %v294_v3 }
   0xc   :  { %283 = vmatpush3.bf16.msra.mxu1 %v297_v6 }
   0xd   :  { %284 = vmatprep.subr.bf16.mxu1 %v303_v0 }
  0x10   :  { %285 = vmatpush3.bf16.msra.mxu1 %v298_v7 }
  0xdd   :  { %v99_v9 = vpop.f32.mrb[0].mxu0 }
  0xde   :  { %v100_v10 = vadd.f32 %v243_v8, %v99_v9  ;;  %v276_v11 = vpop.f32.mrb[1].mxu0 }
  0xdf   :  { %v102_v12 = vpop.f32.mrb[2].mxu0 }
  0xe0   :  { %v106_v13 = vmul.f32 %v100_v10, %v100_v10  ;;  %v103_v14 = vadd.f32 %v243_v8, %v102_v12  ;;  %v277_v15 = vpop.f32.mrb[3].mxu0 }
  0xe2   :  { %v108_v16 = vmul.f32 %v106_v13, %v100_v10  ;;  %v107_v17 = vmul.f32 %v103_v14, %v103_v14 }
  0xe4   :  { %v110_v18 = vmul.f32 0.044715, %v108_v16  ;;  %v109_v19 = vmul.f32 %v107_v17, %v103_v14 }
  0xe6   :  { %v112_v20 = vadd.f32 %v110_v18, %v100_v10  ;;  %v111_v21 = vmul.f32 0.044715, %v109_v19 }
  0xe8   :  { %v114_v22 = vmul.f32 0.7978846, %v112_v20  ;;  %v113_v23 = vadd.f32 %v111_v21, %v103_v14 }
  0xea   :  { %299 = vtanh.f32 %v114_v22  ;;  %v115_v24 = vmul.f32 0.7978846, %v113_v23 }
  0xec   :  { %301 = vtanh.f32 %v115_v24 }
  0xf4   :  { %v300_v25 = vpop.eup %299 }
  0xf5   :  { %v118_v26 = vadd.f32 1.0, %v300_v25 }
  0xf6   :  { %v302_v27 = vpop.eup %301 }
  0xf7   :  { %v120_v28 = vmul.f32 0.5, %v118_v26  ;;  %v119_v29 = vadd.f32 1.0, %v302_v27 }
  0xf9   :  { %v121_v30 = vmul.f32 0.5, %v119_v29  ;;  %v122_v31 = vmul.f32 %v120_v28, %v100_v10 }
  0xfb   :  { %v123_v32 = vmul.f32 %v121_v30, %v103_v14 }
  0xfd   :  { %v126_v33 = vpack.c.bf16 %v123_v32, %v122_v31 }
  0xff   :  { %287 = vmatmul.mubr.msk.bf16.vlgmr.msra.gmra.mrb[0].mxu1 %vm159_vm2, %v126_v33 }
 0x1d2   :  { %v197_v35 = vpop.f32.mrb[0].mxu1 }
 0x1d3   :  { %v204_v37 = vadd.f32 %v197_v35, %v124_v34  ;;  %v288_v38 = vpop.f32.mrb[1].mxu1 }
 0x1d4   :  { %v200_v39 = vpop.f32.mrb[2].mxu1 }
 0x1d5   :  { %206 = vst.msk [vmem:[#allocation2] sm:$0xff] %vm28_vm0, %v204_v37  ;;  %v205_v40 = vadd.f32 %v200_v39, %v125_v36  ;;  %v289_v41 = vpop.f32.mrb[3].mxu1 }
 0x1d7   :  { %207 = vst.msk [vmem:[#allocation2 + $0x8] sm:$0xff] %vm28_vm0, %v205_v40 }
 0x1dc   :  { %v211_v45 = vld [vmem:[#allocation2] sm:$0xff] }
 0x1dd   :  { %v220_v46 = vadd.f32 %v253_v43, %v211_v45 }
 0x1de   :  { %v212_v48 = vld [vmem:[#allocation2 + $0x8] sm:$0xff] }
 0x1df   :  { %v226_v49 = vadd.f32 %v260_v44, %v220_v46  ;;  %v221_v50 = vadd.f32 %v253_v43, %v212_v48 }
 0x1e1   :  { %v256_v51 = vpack.c.bf16 %v226_v49, %v226_v49  ;;  %v227_v52 = vadd.f32 %v261_v47, %v221_v50 }
 0x1e3   :  { %237 = vst.msk [vmem:[%s387_s6] sm:$0xf] %vm236_vm3, %v256_v51  ;;  %v257_v53 = vpack.c.bf16 %v227_v52, %v227_v52 }
 0x1e5   :  { %238 = vst.msk [vmem:[%s387_s6 + $0x4] sm:$0xf] %vm236_vm3, %v257_v53 }

// kernel: encoder_decoder.53
= control target key start
LH: loop header
LB: loop body
LE: loop exit
PB: predicated region body
PF: predicated region fallthrough
CT: control target
= control target key end

     0   :  { %vm19_vm0 = vcmask 261120   ;;  %v150_v0 = vmov 0.0   ;;  %vm151_vm1 = vmmov 0   ;;  %vm118_vm2 = vcmask 257024   ;;  %s195_s1 = inlined_call_operand.vmem [shape: bf16[32,32], index: 1, kind: input, shape index: {}]   ;;  %s196_s0 = inlined_call_operand.vmem [shape: bf16[16,32], index: 0, kind: input, shape index: {}]   ;;  %s197_s2 = inlined_call_operand.vmem [shape: f32[1,32], index: 2, kind: input, shape index: {}]   ;;  %s198_s3 = inlined_call_operand.vmem [shape: bf16[16,32], index: 3, kind: output, shape index: {}]  }
   0x1   :  { %137 = vmatprep.subr.bf16.mxu0 %v150_v0  ;;  %v147_v1 = vld [vmem:[%s195_s1] sm:$0xff]   ;;  %141 = vmatprep.mubr.msk.bf16.mxu0 %vm151_vm1, %v150_v0  ;;  %20 = vst.msk [vmem:[#allocation2] sm:$0xff] %vm19_vm0, %v150_v0  ;;  %21 = vst.msk [vmem:[#allocation2 + $0x8] sm:$0xff] %vm19_vm0, %v150_v0  ;;  %v148_v2 = vld [vmem:[%s195_s1 + $0x8] sm:$0xff]  }
   0x2   :  { %138 = vmatpush3.bf16.msra.mxu0 %v147_v1  ;;  %v149_v3 = vld [vmem:[%s196_s0] sm:$0xff]  }
   0x3   :  { %139 = vmatprep.subr.bf16.mxu0 %v150_v0  ;;  %v129_v12 = vld [vmem:[%s197_s2] ss:$0 sm:$0xff] }
   0x6   :  { %140 = vmatpush3.bf16.msra.mxu0 %v148_v2 }
   0x8   :  { %v22_v4 = vld [vmem:[#allocation2] sm:$0xff]  ;;  %v23_v6 = vld [vmem:[#allocation2 + $0x8] sm:$0xff] }
   0x9   :  { %142 = vmatmul.mubr.msk.bf16.vlgmr.msra.gmra.mrb[0].mxu0 %vm19_vm0, %v149_v3 }
  0xdc   :  { %v85_v5 = vpop.f32.mrb[0].mxu0 }
  0xdd   :  { %v92_v7 = vadd.f32 %v85_v5, %v22_v4  ;;  %v143_v8 = vpop.f32.mrb[1].mxu0 }
  0xde   :  { %v88_v9 = vpop.f32.mrb[2].mxu0 }
  0xdf   :  { %94 = vst.msk [vmem:[#allocation2] sm:$0xff] %vm19_vm0, %v92_v7  ;;  %v93_v10 = vadd.f32 %v88_v9, %v23_v6  ;;  %v144_v11 = vpop.f32.mrb[3].mxu0 }
  0xe1   :  { %95 = vst.msk [vmem:[#allocation2 + $0x8] sm:$0xff] %vm19_vm0, %v93_v10 }
  0xe6   :  { %v99_v13 = vld [vmem:[#allocation2] sm:$0xff] }
  0xe7   :  { %v108_v14 = vadd.f32 %v129_v12, %v99_v13 }
  0xe8   :  { %v100_v15 = vld [vmem:[#allocation2 + $0x8] sm:$0xff] }
  0xe9   :  { %v132_v16 = vpack.c.bf16 %v108_v14, %v108_v14  ;;  %v109_v17 = vadd.f32 %v129_v12, %v100_v15 }
  0xeb   :  { %119 = vst.msk [vmem:[%s198_s3] sm:$0xf] %vm118_vm2, %v132_v16  ;;  %v133_v18 = vpack.c.bf16 %v109_v17, %v109_v17 }
  0xed   :  { %120 = vst.msk [vmem:[%s198_s3 + $0x4] sm:$0xf] %vm118_vm2, %v133_v18 }

// kernel: encoder_decoder.52
= control target key start
LH: loop header
LB: loop body
LE: loop exit
PB: predicated region body
PF: predicated region fallthrough
CT: control target
= control target key end

     0   :  { %s647_s12 = smov 0   ;;  %s649_s13 = smov 0   ;;  %s715_s0 = inlined_call_operand.vmem [shape: bf16[2,4,8,8], index: 0, kind: input, shape index: {}]   ;;  %s716_s1 = inlined_call_operand.vmem [shape: bf16[2,4,8,8], index: 1, kind: input, shape index: {}]   ;;  %s717_s2 = inlined_call_operand.vmem [shape: bf16[2,4,8,8], index: 2, kind: input, shape index: {}]   ;;  %s718_s3 = inlined_call_operand.vmem [shape: bf16[2,4,8,8], index: 3, kind: output, shape index: {}]  }
   0x1   :  { %s651_s14 = smov 0   ;;  %s653_s15 = smov 0  }
   0x2   :  { %s655_s16 = smov 0  }
   0x3 LB: > { %s22_s17 = sadd.s32 1, %s615_s14  ;;  %s25_s18 = sadd.s32 1, %s619_s15  ;;  %s623_s16 = sphi %s655_s16, %s13_s16   ;;  %s619_s15 = sphi %s653_s15, %s722_s15   ;;  %s615_s14 = sphi %s651_s14, %s721_s14   ;;  %s611_s13 = sphi %s649_s13, %s720_s13   ;;  %s607_s12 = sphi %s647_s12, %s719_s12  }
   0x4   : > { %p23_p0 = scmp.ge.s32.totalorder %s22_s17, 4  ;;  %p510_p1 = scmp.ge.s32.totalorder %s623_s16, 1 }
   0x5   : > { %p186_p2 = scmp.lt.s32.totalorder %s623_s16, 9 }
   0x6   : > { %s724_s17 = smov (%p23_p0, %s22_s17), 0  ;;  %s726_s18 = smov (!%p23_p0, %s25_s18), %s619_s15 }
   0x7   : > { %p187_p3 = pnand %p510_p1, %p186_p2  ;;  %p27_p4 = scmp.ge.s32.totalorder %s726_s18, 2 }
   0x8   : > { %p232_p5 = scmp.lt.s32.totalorder (!%p187_p3), %s611_s13, 1  ;;  %p234_p6 = scmp.lt.s32.totalorder (!%p187_p3), %s607_s12, 3  ;;  %v625_v0 = vmov (!%p187_p3), 0.0   ;;  %vm626_vm0 = vmmov (!%p187_p3), 0   ;;  %vm268_vm1 = vcmask (!%p187_p3), 64512   ;;  %v316_v4 = vlaneseq (!%p187_p3) }
   0x9   : > { %s728_s18 = smov (%p27_p4, %s726_s18), 0  ;;  %190 = sbr.rel (%p187_p3) target bundleno = 776 (0x308), region = 32 }
   0xa   : > { %527 = vmatprep.subr.bf16.mxu0 (!%p187_p3), %v625_v0  ;;  %529 = vmatprep.mubr.msk.bf16.mxu0 (!%p187_p3), %vm626_vm0, %v625_v0  ;;  %v317_v5 = vshrl.u32 (!%p187_p3), %v316_v4, 7  ;;  %v319_v6 = vand.u32 (!%p187_p3), 127, %v316_v4  ;;  %vm337_vm3 = vcmask (!%p187_p3), 1043456   ;;  %vm382_vm4 = vcmask (!%p187_p3), 60416  }
   0xb   : > { %533 = vmatprep.subr.bf16.mxu1 (!%p187_p3), %v625_v0  ;;  %535 = vmatprep.mubr.msk.bf16.mxu1 (!%p187_p3), %vm626_vm0, %v625_v0 }
   0xc   : > { %vm320_vm2 = vcmp.ge.s32.totalorder (!%p187_p3), %v317_v5, %v319_v6 }
  0x10   : > { %s730_s13 = smov (!%p232_p5, %s611_s13), 1  ;;  %s732_s12 = smov (!%p234_p6, %s607_s12), 3 }
  0x11   : > { %s511_s19 = sshll.u32 %s730_s13, 2 }
  0x12   : > { %s237_s20 = sadd.s32 %s511_s19, %s732_s12 }
  0x13   : > { %s677_s21 = sshll.u32 %s237_s20, 2 }
  0x14   : > { %s247_s24 = scalar_lea.vmem %s716_s1, %s677_s21  ;;  %s239_s27 = scalar_lea.vmem %s715_s0, %s677_s21 }
  0x15   : > { %v266_v1 = vld [vmem:[%s247_s24] sm:$0xf]  ;;  %s255_s30 = scalar_lea.vmem %s717_s2, %s677_s21  ;;  %s263_s6 = scalar_lea.vmem %s718_s3, %s677_s21 }
  0x16   : > { %v273_v2 = vsel %vm268_vm1, %v266_v1, 0  ;;  %v265_v3 = vld [vmem:[%s239_s27] sm:$0xf] }
  0x17   : > { %528 = vmatpush3.bf16.xpose.msra.mxu0 %v273_v2  ;;  %v267_v19 = vld [vmem:[%s255_s30] sm:$0xf] }
  0x18   : > { %v339_v20 = vsel %vm337_vm3, %v267_v19, 0 }
  0x19   : > { %534 = vmatpush3.bf16.msra.mxu1 %v339_v20 }
  0x1e   : > { %530 = vmatmul.mubr.msk.bf16.vlgmr.msra.gmra.mrb[0].mxu0 %vm268_vm1, %v265_v3 }
  0xf1   : > { %v309_v7 = vpop.f32.mrb[0].mxu0 }
  0xf2   : > { %v315_v8 = vmul.f32 0.35355338, %v309_v7  ;;  %v531_v9 = vpop.f32.mrb[1].mxu0 }
  0xf3   : > { %v312_v10 = vpop.f32.mrb[2].mxu0 }
  0xf4   : > { %v532_v11 = vpop.f32.mrb[3].mxu0  ;;  %v321_v12 = vsel %vm320_vm2, %v315_v8, -1e+30 }
  0xf5   : > { %v322_v13 = vsel %vm268_vm1, %v321_v12, -inf }
  0xf6   : > { %323 = vmax.xlane.f32.xlu0 %v322_v13 }
 0x183   : > { %v324_v14 = vpop.xlane.xlu0 %323 }
 0x184   : > { %v325_v15 = vsub.f32 %v321_v12, %v324_v14 }
 0x186   : > { %v326_v16 = vmul.f32 1.442695, %v325_v15 }
 0x188   : > { %581 = vpow2.f32 %v326_v16 }
 0x192   : > { %v582_v17 = vpop.eup %581 }
 0x193   : > { %v328_v18 = vsel %vm268_vm1, %v582_v17, 0.0 }
 0x194   : > { %329 = vadd.xlane.f32.xlu0 %v328_v18 }
 0x221   : > { %v330_v21 = vpop.xlane.xlu0 %329 }
 0x222   : > { %583 = vrcp.f32 %v330_v21 }
 0x22c   : > { %v584_v22 = vpop.eup %583 }
 0x22d   : > { %v332_v23 = vmul.f32 %v584_v22, %v582_v17 }
 0x22f   : > { %v333_v24 = vpack.c.bf16 %v332_v23, %v332_v23 }
 0x231   : > { %536 = vmatmul.mubr.msk.bf16.vlgmr.msra.gmra.mrb[0].mxu1 %vm268_vm1, %v333_v24 }
 0x304   : > { %v375_v25 = vpop.f32.mrb[0].mxu1 }
 0x305   : > { %v381_v26 = vpack.c.bf16 %v375_v25, %v375_v25  ;;  %v537_v27 = vpop.f32.mrb[1].mxu1 }
 0x306   : > { %v378_v28 = vpop.f32.mrb[2].mxu1 }
 0x307   : > { %383 = vst.msk [vmem:[%s263_s6] sm:$0xf] %vm382_vm4, %v381_v26  ;;  %v538_v29 = vpop.f32.mrb[3].mxu1 }
 0x308 PF: > { %s13_s16 = sadd.s32 1, %s623_s16   ;;  %s719_s12 = smov %s615_s14 }
 0x309   : > { %p10_p7 = scmp.ge.s32.totalorder %s13_s16, 10   ;;  %s720_s13 = smov %s619_s15 }
 0x30a   : > { %s721_s14 = smov %s724_s17  ;;  %s722_s15 = smov %s728_s18 }
 0x30b   :  { %12 = sbr.rel (!%p10_p7) target bundleno = 3 (0x3), region = 68 }

// kernel: encoder_decoder.54
= control target key start
LH: loop header
LB: loop body
LE: loop exit
PB: predicated region body
PF: predicated region fallthrough
CT: control target
= control target key end

     0   :  { %vm27_vm0 = vcmask 261120   ;;  %vm81_vm1 = vcmask 257024   ;;  %s153_s0 = inlined_call_operand.vmem [shape: bf16[16,32], index: 0, kind: input, shape index: {}]   ;;  %s154_s1 = inlined_call_operand.vmem [shape: bf16[16,32], index: 1, kind: input, shape index: {}]   ;;  %s155_s2 = inlined_call_operand.vmem [shape: f32[1,32], index: 2, kind: input, shape index: {}]   ;;  %s156_s3 = inlined_call_operand.vmem [shape: f32[1,32], index: 3, kind: input, shape index: {}]   ;;  %s157_s4 = inlined_call_operand.vmem [shape: bf16[16,32], index: 4, kind: output, shape index: {}]  }
   0x1   :  { %v95_v0 = vld [vmem:[%s153_s0] sm:$0xff]  }
   0x2   :  { %v99_v1 = vld [vmem:[%s154_s1] sm:$0xff]   ;;  %v96_v2 = vunpack.c.l.bf16 %v95_v0  ;;  %v97_v4 = vunpack.c.h.bf16 %v95_v0 }
   0x3   :  { %v100_v3 = vunpack.c.l.bf16 %v99_v1  ;;  %v101_v5 = vunpack.c.h.bf16 %v99_v1  ;;  %v88_v27 = vld [vmem:[%s155_s2] ss:$0 sm:$0xff] }
   0x4   :  { %v89_v29 = vld [vmem:[%s156_s3] ss:$0 sm:$0xff] }
   0x5   :  { %v25_v6 = vadd.f32 %v100_v3, %v96_v2  ;;  %v26_v7 = vadd.f32 %v101_v5, %v97_v4 }
   0x7   :  { %v28_v8 = vsel %vm27_vm0, %v25_v6, 0.0  ;;  %v31_v9 = vsel %vm27_vm0, %v26_v7, 0.0 }
   0x8   :  { %29 = vadd.xlane.f32.xlu0 %v28_v8 }
   0xc   :  { %32 = vadd.xlane.f32.xlu0 %v31_v9 }
  0x95   :  { %v30_v10 = vpop.xlane.xlu0 %29 }
  0x96   :  { %v35_v11 = vmul.f32 0.03125, %v30_v10 }
  0x98   :  { %v37_v12 = vsub.f32 %v25_v6, %v35_v11 }
  0x99   :  { %v33_v13 = vpop.xlane.xlu0 %32 }
  0x9a   :  { %v36_v14 = vmul.f32 0.03125, %v33_v13  ;;  %v39_v15 = vmul.f32 %v37_v12, %v37_v12 }
  0x9c   :  { %v38_v16 = vsub.f32 %v26_v7, %v36_v14  ;;  %v41_v17 = vsel %vm27_vm0, %v39_v15, 0.0 }
  0x9d   :  { %42 = vadd.xlane.f32.xlu1 %v41_v17 }
  0x9e   :  { %v40_v18 = vmul.f32 %v38_v16, %v38_v16 }
  0xa0   :  { %v44_v19 = vsel %vm27_vm0, %v40_v18, 0.0 }
  0xa1   :  { %45 = vadd.xlane.f32.xlu1 %v44_v19 }
 0x12a   :  { %v43_v20 = vpop.xlane.xlu1 %42 }
 0x12b   :  { %v47_v21 = vmul.f32 0.03125, %v43_v20 }
 0x12d   :  { %v49_v22 = vadd.f32 1e-05, %v47_v21 }
 0x12e   :  { %v46_v23 = vpop.xlane.xlu1 %45 }
 0x12f   :  { %102 = vrsqrt.f32 %v49_v22  ;;  %v48_v24 = vmul.f32 0.03125, %v46_v23 }
 0x131   :  { %v50_v25 = vadd.f32 1e-05, %v48_v24 }
 0x133   :  { %104 = vrsqrt.f32 %v50_v25 }
 0x139   :  { %v103_v26 = vpop.eup %102 }
 0x13a   :  { %v53_v28 = vmul.f32 %v103_v26, %v37_v12 }
 0x13c   :  { %v62_v30 = vmul.f32 %v88_v27, %v53_v28 }
 0x13d   :  { %v105_v31 = vpop.eup %104 }
 0x13e   :  { %v71_v32 = vadd.f32 %v89_v29, %v62_v30  ;;  %v54_v33 = vmul.f32 %v105_v31, %v38_v16 }
 0x140   :  { %v92_v34 = vpack.c.bf16 %v71_v32, %v71_v32  ;;  %v63_v35 = vmul.f32 %v88_v27, %v54_v33 }
 0x142   :  { %82 = vst.msk [vmem:[%s157_s4] sm:$0xf] %vm81_vm1, %v92_v34  ;;  %v72_v36 = vadd.f32 %v89_v29, %v63_v35 }
 0x144   :  { %v93_v37 = vpack.c.bf16 %v72_v36, %v72_v36 }
 0x146   :  { %83 = vst.msk [vmem:[%s157_s4 + $0x4] sm:$0xf] %vm81_vm1, %v93_v37 }

// kernel: encoder_decoder.57
= control target key start
LH: loop header
LB: loop body
LE: loop exit
PB: predicated region body
PF: predicated region fallthrough
CT: control target
= control target key end

     0   :  { %s647_s12 = smov 0   ;;  %s649_s13 = smov 0   ;;  %s713_s0 = inlined_call_operand.vmem [shape: bf16[2,4,8,8], index: 0, kind: input, shape index: {}]   ;;  %s714_s1 = inlined_call_operand.vmem [shape: bf16[2,4,5,8], index: 1, kind: input, shape index: {}]   ;;  %s715_s2 = inlined_call_operand.vmem [shape: bf16[2,4,5,8], index: 2, kind: input, shape index: {}]   ;;  %s716_s3 = inlined_call_operand.vmem [shape: bf16[2,4,8,8], index: 3, kind: output, shape index: {}]  }
   0x1   :  { %s651_s14 = smov 0   ;;  %s653_s15 = smov 0  }
   0x2   :  { %s655_s16 = smov 0  }
   0x3 LB: > { %s22_s17 = sadd.s32 1, %s614_s14  ;;  %s25_s18 = sadd.s32 1, %s618_s15  ;;  %s622_s16 = sphi %s655_s16, %s13_s16   ;;  %s618_s15 = sphi %s653_s15, %s720_s15   ;;  %s614_s14 = sphi %s651_s14, %s719_s14   ;;  %s610_s13 = sphi %s649_s13, %s718_s13   ;;  %s606_s12 = sphi %s647_s12, %s717_s12  }
   0x4   : > { %p23_p0 = scmp.ge.s32.totalorder %s22_s17, 4  ;;  %p508_p1 = scmp.ge.s32.totalorder %s622_s16, 1 }
   0x5   : > { %p186_p2 = scmp.lt.s32.totalorder %s622_s16, 9 }
   0x6   : > { %s722_s17 = smov (%p23_p0, %s22_s17), 0  ;;  %s724_s18 = smov (!%p23_p0, %s25_s18), %s618_s15 }
   0x7   : > { %p187_p3 = pnand %p508_p1, %p186_p2  ;;  %p27_p4 = scmp.ge.s32.totalorder %s724_s18, 2 }
   0x8   : > { %p232_p5 = scmp.lt.s32.totalorder (!%p187_p3), %s610_s13, 1  ;;  %p234_p6 = scmp.lt.s32.totalorder (!%p187_p3), %s606_s12, 3  ;;  %v624_v0 = vmov (!%p187_p3), 0.0   ;;  %vm625_vm0 = vmmov (!%p187_p3), 0   ;;  %vm268_vm1 = vcmask (!%p187_p3), 64512   ;;  %vm316_vm2 = vcmask (!%p187_p3), 39936  }
   0x9   : > { %s726_s18 = smov (%p27_p4, %s724_s18), 0  ;;  %190 = sbr.rel (%p187_p3) target bundleno = 775 (0x307), region = 32 }
   0xa   : > { %525 = vmatprep.subr.bf16.mxu0 (!%p187_p3), %v624_v0  ;;  %527 = vmatprep.mubr.msk.bf16.mxu0 (!%p187_p3), %vm625_vm0, %v624_v0  ;;  %vm332_vm3 = vcmask (!%p187_p3), 1041408   ;;  %vm333_vm4 = vcmask (!%p187_p3), 1042432   ;;  %v626_v16 = vmov (!%p187_p3), 65535   ;;  %vm380_vm5 = vcmask (!%p187_p3), 60416  }
   0xb   : > { %531 = vmatprep.subr.bf16.mxu1 (!%p187_p3), %v624_v0  ;;  %533 = vmatprep.mubr.msk.bf16.mxu1 (!%p187_p3), %vm625_vm0, %v624_v0  ;;  %v334_v17 = vsel (!%p187_p3), %vm332_vm3, 4294967295, %v626_v16 }
   0xc   : > { %v335_v18 = vsel (!%p187_p3), %vm333_vm4, %v334_v17, 0 }
  0x10   : > { %s728_s13 = smov (!%p232_p5, %s610_s13), 1  ;;  %s730_s12 = smov (!%p234_p6, %s606_s12), 3 }
  0x11   : > { %s509_s19 = sshll.u32 %s728_s13, 2 }
  0x12   : > { %s237_s20 = sadd.s32 %s509_s19, %s730_s12 }
  0x13   : > { %s677_s21 = sshll.u32 %s237_s20, 2 }
  0x14   : > { %s247_s24 = scalar_lea.vmem %s714_s1, %s677_s21  ;;  %s239_s27 = scalar_lea.vmem %s713_s0, %s677_s21 }
  0x15   : > { %v266_v1 = vld [vmem:[%s247_s24] sm:$0x7]  ;;  %s255_s30 = scalar_lea.vmem %s715_s2, %s677_s21  ;;  %s263_s6 = scalar_lea.vmem %s716_s3, %s677_s21 }
  0x16   : > { %v273_v2 = vsel %vm268_vm1, %v266_v1, 0  ;;  %v265_v3 = vld [vmem:[%s239_s27] sm:$0xf] }
  0x17   : > { %526 = vmatpush3.bf16.xpose.msra.mxu0 %v273_v2  ;;  %v267_v15 = vld [vmem:[%s255_s30] sm:$0x7] }
  0x18   : > { %v337_v19 = vand.u32 %v335_v18, %v267_v15 }
  0x1a   : > { %532 = vmatpush3.bf16.msra.mxu1 %v337_v19 }
  0x1e   : > { %528 = vmatmul.mubr.msk.bf16.vlgmr.msra.gmra.mrb[0].mxu0 %vm268_vm1, %v265_v3 }
  0xf1   : > { %v309_v4 = vpop.f32.mrb[0].mxu0 }
  0xf2   : > { %v315_v5 = vmul.f32 0.35355338, %v309_v4  ;;  %v529_v6 = vpop.f32.mrb[1].mxu0 }
  0xf3   : > { %v312_v7 = vpop.f32.mrb[2].mxu0 }
  0xf4   : > { %v530_v8 = vpop.f32.mrb[3].mxu0  ;;  %v317_v9 = vsel %vm316_vm2, %v315_v5, -inf }
  0xf5   : > { %318 = vmax.xlane.f32.xlu0 %v317_v9 }
 0x182   : > { %v319_v10 = vpop.xlane.xlu0 %318 }
 0x183   : > { %v320_v11 = vsub.f32 %v315_v5, %v319_v10 }
 0x185   : > { %v321_v12 = vmul.f32 1.442695, %v320_v11 }
 0x187   : > { %580 = vpow2.f32 %v321_v12 }
 0x191   : > { %v581_v13 = vpop.eup %580 }
 0x192   : > { %v323_v14 = vsel %vm316_vm2, %v581_v13, 0.0 }
 0x193   : > { %324 = vadd.xlane.f32.xlu0 %v323_v14 }
 0x220   : > { %v325_v20 = vpop.xlane.xlu0 %324 }
 0x221   : > { %582 = vrcp.f32 %v325_v20 }
 0x22b   : > { %v583_v21 = vpop.eup %582 }
 0x22c   : > { %v327_v22 = vmul.f32 %v583_v21, %v581_v13 }
 0x22e   : > { %v328_v23 = vpack.c.bf16 %v327_v22, %v327_v22 }
 0x230   : > { %534 = vmatmul.mubr.msk.bf16.vlgmr.msra.gmra.mrb[0].mxu1 %vm316_vm2, %v328_v23 }
 0x303   : > { %v373_v24 = vpop.f32.mrb[0].mxu1 }
 0x304   : > { %v379_v25 = vpack.c.bf16 %v373_v24, %v373_v24  ;;  %v535_v26 = vpop.f32.mrb[1].mxu1 }
 0x305   : > { %v376_v27 = vpop.f32.mrb[2].mxu1 }
 0x306   : > { %381 = vst.msk [vmem:[%s263_s6] sm:$0xf] %vm380_vm5, %v379_v25  ;;  %v536_v28 = vpop.f32.mrb[3].mxu1 }
 0x307 PF: > { %s13_s16 = sadd.s32 1, %s622_s16   ;;  %s717_s12 = smov %s614_s14 }
 0x308   : > { %p10_p7 = scmp.ge.s32.totalorder %s13_s16, 10   ;;  %s718_s13 = smov %s618_s15 }
 0x309   : > { %s719_s14 = smov %s722_s17  ;;  %s720_s15 = smov %s726_s18 }
 0x30a   :  { %12 = sbr.rel (!%p10_p7) target bundleno = 3 (0x3), region = 68 }

// kernel: encoder_decoder.73
= control target key start
LH: loop header
LB: loop body
LE: loop exit
PB: predicated region body
PF: predicated region fallthrough
CT: control target
= control target key end

     0   :  { %v176_v1 = vmov 0.0   ;;  %vm177_vm0 = vmmov 0   ;;  %s225_s0 = inlined_call_operand.vmem [shape: bf16[16,32], index: 0, kind: input, shape index: {}]   ;;  %s226_s1 = inlined_call_operand.vmem [shape: bf16[32,128], index: 1, kind: input, shape index: {}]   ;;  %s227_s2 = inlined_call_operand.vmem [shape: f32[1,128], index: 2, kind: input, shape index: {}]   ;;  %s228_s3 = inlined_call_operand.hbm [shape: f32[16,128], index: 3, kind: output, shape index: {}]  }
   0x1   :  { %v149_v0 = vld [vmem:[%s226_s1] sm:$0xff]   ;;  %136 = vmatprep.subr.bf16.mxu0 %v176_v1  ;;  %v150_v2 = vld [vmem:[%s226_s1 + $0x8] sm:$0xff]   ;;  %140 = vmatprep.mubr.msk.bf16.mxu0 %vm177_vm0, %v176_v1 }
   0x2   :  { %137 = vmatpush3.bf16.msra.mxu0 %v149_v0 }
   0x3   :  { %138 = vmatprep.subr.bf16.mxu0 %v176_v1 }
   0x4   :  { %8 = vsyncpa [#allocation4], 0  ;;  %v151_v3 = vld [vmem:[%s225_s0] sm:$0xff]   ;;  %vm47_vm1 = vcmask 261120   ;;  %s178_s20 = smov [#allocation3]  }
   0x5   :  { %v132_v4 = vld [vmem:[%s227_s2] ss:$0 sm:$0xff]  ;;  %s117_s21 = sshll.u32 %s178_s20, 4  ;;  %s118_s21 = int_to_ptr.vmem [resolvable:$true] %s117_s21 }
   0x6   :  { %139 = vmatpush3.bf16.msra.mxu0 %v150_v2  ;;  %s152_s1 = scalar_lea.vmem %s118_s21, 256  ;;  %p157_p1 = scmp.lt.s32.totalorder %s118_s21, %s118_s21 }
   0x7   :  { %p153_p0 = scmp.ne.s32.totalorder %s118_s21, %s152_s1  ;;  %p158_p2 = scmp.lt.s32.totalorder %s152_s1, %s152_s1 }
   0x9   :  { %141 = vmatmul.mubr.msk.bf16.vlgmr.msra.gmra.mrb[0].mxu0 %vm47_vm1, %v151_v3  ;;  %p159_p3 = por %p158_p2, %p157_p1 }
   0xb   :  { %p160_p4 = pnand %p159_p3, %p153_p0 }
  0xdc   :  { %v85_v5 = vpop.f32.mrb[0].mxu0 }
  0xdd   :  { %v108_v6 = vadd.f32 %v132_v4, %v85_v5  ;;  %v142_v7 = vpop.f32.mrb[1].mxu0 }
  0xde   :  { %v88_v8 = vpop.f32.mrb[2].mxu0 }
  0xdf   :  { %110 = vst [vmem:[#allocation3] sm:$0xff] %v108_v6  ;;  %v109_v9 = vadd.f32 %v132_v4, %v88_v8  ;;  %v143_v10 = vpop.f32.mrb[3].mxu0 }
  0xe1   :  { %111 = vst [vmem:[#allocation3 + $0x8] sm:$0xff] %v109_v9 }
  0xe2   :  { %163 = shalt.err (!%p160_p4)
}
  0xe3   :  { %s164_s22 = scalar_lea.hbm %s228_s3, 256 }
  0xe4   :  { %p165_p5 = scmp.ne.s32.totalorder %s228_s3, %s164_s22  ;;  %p168_p6 = scmp.lt.u32.totalorder %s164_s22, %s228_s3 }
  0xe6   :  { %p170_p7 = pnand %p168_p6, %p165_p5 }
  0xe8   :  { %173 = shalt.err (!%p170_p7)
}
  0xe9   :  { %s179_s27 = smov 128   ;;  %s180_s28 = smov 8  }
  0xea   :  { %123 = dma.vmem_to_hbm [thread:$0]  %s118_s21, 256, %s228_s3, [#allocation4], %s179_s27, %s179_s27, %s180_s28  }
  0xeb   :  { %174 = dma.done.wait [#allocation4], 256  }
  0xec   :  { %175 = vsyncadd [#allocation4], 4294967040 }
  0xed   :  { %127 = vsyncpa [#allocation4], 1 }

// kernel: encoder_decoder.60
= control target key start
LH: loop header
LB: loop body
LE: loop exit
PB: predicated region body
PF: predicated region fallthrough
CT: control target
= control target key end

     0   :  { %vm25_vm0 = vcmask 261120   ;;  %v270_v0 = vmov 0.0   ;;  %vm271_vm1 = vmmov 0   ;;  %vm140_vm2 = vcmask 523264   ;;  %s340_s1 = inlined_call_operand.vmem [shape: bf16[32,64], index: 1, kind: input, shape index: {}]   ;;  %s341_s3 = inlined_call_operand.vmem [shape: bf16[64,32], index: 3, kind: input, shape index: {}]   ;;  %s342_s0 = inlined_call_operand.vmem [shape: bf16[16,32], index: 0, kind: input, shape index: {}]   ;;  %s343_s2 = inlined_call_operand.vmem [shape: f32[1,64], index: 2, kind: input, shape index: {}]   ;;  %s344_s4 = inlined_call_operand.vmem [shape: f32[1,32], index: 4, kind: input, shape index: {}]   ;;  %s345_s5 = inlined_call_operand.vmem [shape: bf16[16,32], index: 5, kind: output, shape index: {}]  }
   0x1   :  { %241 = vmatprep.subr.bf16.mxu0 %v270_v0  ;;  %v263_v1 = vld [vmem:[%s340_s1] sm:$0xff]   ;;  %245 = vmatprep.mubr.msk.bf16.mxu0 %vm271_vm1, %v270_v0  ;;  %26 = vst.msk [vmem:[#allocation2] sm:$0xff] %vm25_vm0, %v270_v0  ;;  %27 = vst.msk [vmem:[#allocation2 + $0x8] sm:$0xff] %vm25_vm0, %v270_v0  ;;  %v264_v2 = vld [vmem:[%s340_s1 + $0x8] sm:$0xff]   ;;  %vm211_vm3 = vcmask 257024  }
   0x2   :  { %249 = vmatprep.subr.bf16.mxu1 %v270_v0  ;;  %257 = vmatprep.mubr.msk.bf16.mxu1 %vm271_vm1, %v270_v0  ;;  %v266_v3 = vld [vmem:[%s341_s3] sm:$0xff]   ;;  %v267_v5 = vld [vmem:[%s341_s3 + $0x8] sm:$0xff]   ;;  %v268_v6 = vld [vmem:[%s341_s3 + $0x10] sm:$0xff]  }
   0x3   :  { %242 = vmatpush3.bf16.msra.mxu0 %v263_v1  ;;  %v265_v4 = vld [vmem:[%s342_s0] sm:$0xff]   ;;  %250 = vmatpush3.bf16.msra.mxu1 %v266_v3  ;;  %v269_v7 = vld [vmem:[%s341_s3 + $0x18] sm:$0xff]  }
   0x4   :  { %243 = vmatprep.subr.bf16.mxu0 %v270_v0  ;;  %251 = vmatprep.subr.bf16.mxu1 %v270_v0  ;;  %v218_v8 = vld [vmem:[%s343_s2] ss:$0 sm:$0xff] }
   0x5   :  { %v228_v26 = vld [vmem:[%s344_s4] ss:$0 sm:$0xff] }
   0x7   :  { %244 = vmatpush3.bf16.msra.mxu0 %v264_v2  ;;  %252 = vmatpush3.bf16.msra.mxu1 %v267_v5 }
   0x8   :  { %253 = vmatprep.subr.bf16.mxu1 %v270_v0  ;;  %v105_v18 = vld [vmem:[#allocation2] sm:$0xff]  ;;  %v106_v20 = vld [vmem:[#allocation2 + $0x8] sm:$0xff] }
   0xa   :  { %246 = vmatmul.mubr.msk.bf16.vlgmr.msra.gmra.mrb[0].mxu0 %vm25_vm0, %v265_v4 }
   0xb   :  { %254 = vmatpush3.bf16.msra.mxu1 %v268_v6 }
   0xc   :  { %255 = vmatprep.subr.bf16.mxu1 %v270_v0 }
   0xf   :  { %256 = vmatpush3.bf16.msra.mxu1 %v269_v7 }
  0xdd   :  { %v96_v9 = vpop.f32.mrb[0].mxu0 }
  0xde   :  { %v97_v10 = vadd.f32 %v218_v8, %v96_v9  ;;  %v247_v11 = vpop.f32.mrb[1].mxu0 }
  0xdf   :  { %v99_v12 = vpop.f32.mrb[2].mxu0 }
  0xe0   :  { %v100_v13 = vadd.f32 %v218_v8, %v99_v12  ;;  %v248_v14 = vpop.f32.mrb[3].mxu0  ;;  %v103_v15 = vmax.f32 %v97_v10, 0.0 }
  0xe2   :  { %v104_v16 = vmax.f32 %v100_v13, 0.0 }
  0xe4   :  { %v107_v17 = vpack.c.bf16 %v104_v16, %v103_v15 }
  0xe6   :  { %258 = vmatmul.mubr.msk.bf16.vlgmr.msra.gmra.mrb[0].mxu1 %vm140_vm2, %v107_v17 }
 0x1b9   :  { %v178_v19 = vpop.f32.mrb[0].mxu1 }
 0x1ba   :  { %v185_v21 = vadd.f32 %v178_v19, %v105_v18  ;;  %v259_v22 = vpop.f32.mrb[1].mxu1 }
 0x1bb   :  { %v181_v23 = vpop.f32.mrb[2].mxu1 }
 0x1bc   :  { %187 = vst.msk [vmem:[#allocation2] sm:$0xff] %vm25_vm0, %v185_v21  ;;  %v186_v24 = vadd.f32 %v181_v23, %v106_v20  ;;  %v260_v25 = vpop.f32.mrb[3].mxu1 }
 0x1be   :  { %188 = vst.msk [vmem:[#allocation2 + $0x8] sm:$0xff] %vm25_vm0, %v186_v24 }
 0x1c3   :  { %v192_v27 = vld [vmem:[#allocation2] sm:$0xff] }
 0x1c4   :  { %v201_v28 = vadd.f32 %v228_v26, %v192_v27 }
 0x1c5   :  { %v193_v29 = vld [vmem:[#allocation2 + $0x8] sm:$0xff] }
 0x1c6   :  { %v231_v30 = vpack.c.bf16 %v201_v28, %v201_v28  ;;  %v202_v31 = vadd.f32 %v228_v26, %v193_v29 }
 0x1c8   :  { %212 = vst.msk [vmem:[%s345_s5] sm:$0xf] %vm211_vm3, %v231_v30  ;;  %v232_v32 = vpack.c.bf16 %v202_v31, %v202_v31 }
 0x1ca   :  { %213 = vst.msk [vmem:[%s345_s5 + $0x4] sm:$0xf] %vm211_vm3, %v232_v32 }

</bundles_post_ra>
